<compile_context>
chip_gen: v5e
topology: v5e:2x2
jax: 0.10.0
libtpu: 0.0.40
codegen_flags: <defaults>
</compile_context>

<pallas_src>
import numpy as np
import jax
import jax.numpy as jnp
from jax.experimental import pallas as pl
from jax.experimental.pallas import tpu as pltpu

# ----------------------------------------------------------------------------
# Constants for wavelet_type='sym5'
# ----------------------------------------------------------------------------
NUM_CA = 20                  # self.num_cA
NUM_CD = (20, 31, 54)        # self.num_cD
REC_LEN = 100                # waverec output length
REG_C = 2 * NUM_CA + 2       # 42 regression channels
GT_C = 2 * NUM_CA + 5        # 45 ground-truth channels
OHEM_RATIO = 3.0
LANE = 128                   # TPU lane width
MAX_TILE = 1024              # pixel tile (lane axis), multiple of 128

# sym5 decomposition low-pass filter (pywt); rec_lo = reversed(dec_lo)
_SYM5_DEC_LO = np.array([
    0.027333068345077982, 0.029519490925774643, -0.039134249302383094,
    0.1993975339773936, 0.7234076904024206, 0.6339789634582119,
    0.01660210576452232, -0.17532808990845047, -0.021101834024758855,
    0.019538882735286728], dtype=np.float64)
_SYM5_REC_LO = _SYM5_DEC_LO[::-1]


def _idwt_lo_matrix(length):
    """Linear map cA(length) -> idwt(cA, 0) of length 2*length - filt_len + 2."""
    f = _SYM5_REC_LO.shape[0]
    out_len = 2 * length - f + 2
    m = np.zeros((length, out_len), dtype=np.float64)
    for k in range(length):
        for j in range(f):
            idx = 2 * k + j - (f - 2)
            if 0 <= idx < out_len:
                m[k, idx] += _SYM5_REC_LO[j]
    return m


def build_waverec_matrix_t():
    """waverec([cA, 0(20), 0(31), 0(54)], sym5) as R^T of shape (100, 20).

    For channel-major data d (20, P):  rec = R^T @ d  has shape (100, P).
    """
    r = np.eye(NUM_CA, dtype=np.float64)
    for cd_len in NUM_CD:
        if r.shape[1] > cd_len:          # pywt/ptwt off-by-one length fix-up
            r = r[:, :cd_len]
        r = r @ _idwt_lo_matrix(r.shape[1])
    assert r.shape == (NUM_CA, REC_LEN)
    return jnp.asarray(r.T, dtype=jnp.float32)


# ----------------------------------------------------------------------------
# Shared channel-major math (used by the Pallas kernel and the JAX reference)
# ----------------------------------------------------------------------------
def _wl_math(cls, reg, gt, vb, Rt):
    """cls (4,P), reg (42,P), gt (45,P), vb bool (1,P) validity, Rt (100,20).

    Returns (ce_neg (1,P), rows: tuple of 8 lane-partial stat rows (1,P)).
    All rows are guaranteed finite (garbage in invalid lanes is masked out);
    every op is lane-local, so invalid lanes never contaminate valid ones.
    """
    valid = vb.astype(jnp.float32)

    tr_mask = jnp.where(vb, gt[0:1, :], 0.0)
    tcl_mask = jnp.where(vb, gt[1:2, :], 0.0)
    train_mask = jnp.where(vb, gt[2:3, :], 0.0)

    tr0, tr1 = cls[0:1, :], cls[1:2, :]
    tc0, tc1 = cls[2:3, :], cls[3:4, :]

    # 2-class cross entropy; stable lse = max(a,b) + log(1 + exp(-|a-b|))
    lse_tr = jnp.maximum(tr0, tr1) + jnp.log(1.0 + jnp.exp(-jnp.abs(tr0 - tr1)))
    ce_tr = jnp.where(vb, lse_tr - (tr0 * (1.0 - tr_mask) + tr1 * tr_mask), 0.0)
    lse_tc = jnp.maximum(tc0, tc1) + jnp.log(1.0 + jnp.exp(-jnp.abs(tc0 - tc1)))
    ce_tcl = jnp.where(vb, lse_tc - (tc0 * (1.0 - tcl_mask) + tc1 * tcl_mask), 0.0)

    pos = tr_mask * train_mask               # tr_train_mask
    neg = (1.0 - tr_mask) * train_mask       # OHEM negatives
    tcl_neg = (1.0 - pos) * valid            # tr_neg_mask (real pixels only)

    # wavelet regression branch: rec(pred) - rec(gt) == rec(pred - gt)
    d_real = reg[0:NUM_CA, :] - gt[3:3 + NUM_CA, :]
    d_imag = reg[NUM_CA + 1:2 * NUM_CA + 1, :] - gt[4 + NUM_CA:4 + 2 * NUM_CA, :]
    d_xc = reg[NUM_CA:NUM_CA + 1, :] - gt[3 + NUM_CA:4 + NUM_CA, :]
    d_yc = reg[2 * NUM_CA + 1:2 * NUM_CA + 2, :] - gt[4 + 2 * NUM_CA:5 + 2 * NUM_CA, :]

    diff_x = jnp.dot(Rt, d_real, preferred_element_type=jnp.float32) + d_xc
    diff_y = jnp.dot(Rt, d_imag, preferred_element_type=jnp.float32) + d_yc
    ax, ay = jnp.abs(diff_x), jnp.abs(diff_y)
    sl1_x = jnp.where(ax < 1.0, 0.5 * ax * ax, ax - 0.5)   # smooth_l1, beta=1
    sl1_y = jnp.where(ay < 1.0, 0.5 * ay * ay, ay - 0.5)
    sx_row = jnp.where(vb, jnp.sum(sl1_x, axis=0, keepdims=True), 0.0)
    sy_row = jnp.where(vb, jnp.sum(sl1_y, axis=0, keepdims=True), 0.0)

    ce_neg = ce_tr * neg
    rows = (pos,                   # 0: n_pos (tr_train count)
            neg,                   # 1: OHEM negative count
            pos * ce_tr,           # 2: OHEM positive CE sum
            pos * ce_tcl,          # 3: tcl positive CE sum
            tcl_neg * ce_tcl,      # 4: tcl negative CE sum
            tcl_neg,               # 5: tcl negative count
            pos * sx_row,          # 6: smooth-L1 x sum (masked)
            pos * sy_row)          # 7: smooth-L1 y sum (masked)
    return ce_neg, rows


# ----------------------------------------------------------------------------
# Pallas kernel: one FPN level, grid (batch, pixel_tiles), channel-major
# ----------------------------------------------------------------------------
def _make_level_kernel(hw, tile_p):
    def kernel(cls_ref, reg_ref, gt_ref, rt_ref, ce_ref, stats_ref):
        i = pl.program_id(1)

        @pl.when(i == 0)
        def _init():
            stats_ref[...] = jnp.zeros_like(stats_ref)

        # validity mask for ragged / padded lanes of this tile
        lane = jax.lax.broadcasted_iota(jnp.int32, (1, tile_p), 1)
        vb = (i * tile_p + lane) < hw

        ce_neg, rows = _wl_math(cls_ref[...], reg_ref[...], gt_ref[...],
                                vb, rt_ref[...])
        ce_ref[...] = ce_neg                       # lane-dense (1, tile_p)
        for j, r in enumerate(rows):               # lane-partial accumulation
            stats_ref[j:j + 1, :] += r
    return kernel


def _run_level_kernel(cls4, reg4, gt4, Rt):
    """cls4 (N,4,H,W), reg4 (N,42,H,W), gt4 (N,45,H,W), NCHW float32."""
    n, _, h, w = cls4.shape
    hw = h * w

    # free reshape to channel-major (N, C, H*W) -- no transpose
    cls2 = cls4.reshape(n, 4, hw).astype(jnp.float32)
    reg2 = reg4.reshape(n, REG_C, hw).astype(jnp.float32)
    gt2 = gt4.reshape(n, GT_C, hw).astype(jnp.float32)

    if hw < LANE:
        # tiny level: pad pixel axis to one full lane tile (cheap, tiny array)
        pad = LANE - hw
        cls2 = jnp.pad(cls2, ((0, 0), (0, 0), (0, pad)))
        reg2 = jnp.pad(reg2, ((0, 0), (0, 0), (0, pad)))
        gt2 = jnp.pad(gt2, ((0, 0), (0, 0), (0, pad)))
        hw_arr = LANE
    else:
        hw_arr = hw

    tile_p = min(MAX_TILE, LANE * (hw_arr // LANE))   # multiple of 128, <= hw_arr
    n_tiles = pl.cdiv(hw_arr, tile_p)                 # last tile may be ragged

    kernel = _make_level_kernel(hw, tile_p)
    ce, stats = pl.pallas_call(
        kernel,
        out_shape=(
            # explicit singleton sublane axis -> trailing block dims always
            # equal the full array dims, valid for any n_tiles
            jax.ShapeDtypeStruct((n, n_tiles, 1, tile_p), jnp.float32),
            jax.ShapeDtypeStruct((n, 8, tile_p), jnp.float32),
        ),
        grid_spec=pltpu.PrefetchScalarGridSpec(
            num_scalar_prefetch=0,
            grid=(n, n_tiles),
            in_specs=[
                pl.BlockSpec((None, 4, tile_p), lambda b, i: (b, 0, i)),
                pl.BlockSpec((None, REG_C, tile_p), lambda b, i: (b, 0, i)),
                pl.BlockSpec((None, GT_C, tile_p), lambda b, i: (b, 0, i)),
                pl.BlockSpec((REC_LEN, NUM_CA), lambda b, i: (0, 0)),
            ],
            out_specs=(
                pl.BlockSpec((None, None, 1, tile_p), lambda b, i: (b, i, 0, 0)),
                pl.BlockSpec((None, 8, tile_p), lambda b, i: (b, 0, 0)),
            ),
        ),
        compiler_params=pltpu.CompilerParams(
            dimension_semantics=("parallel", "arbitrary")),
    )(cls2, reg2, gt2, Rt)

    totals = jnp.sum(stats, axis=(0, 2))   # (8,) final reduce done in JAX
    return ce.reshape(-1), totals          # padded CE entries are exactly 0


# ----------------------------------------------------------------------------
# Host-side combination (OHEM top-k + final normalizations)
# ----------------------------------------------------------------------------
def _combine_losses(stats, ce_neg_vec, ohem_ratio=OHEM_RATIO):
    n_pos, neg_cnt, loss_pos = stats[0], stats[1], stats[2]
    tcl_pos_sum, tcl_neg_sum, tcl_neg_cnt = stats[3], stats[4], stats[5]
    sx, sy = stats[6], stats[7]
    has_pos = n_pos > 0.0

    # OHEM: n_neg = min(#neg, floor(ohem_ratio * n_pos)) if n_pos > 0 else 100
    n_neg = jnp.where(has_pos,
                      jnp.minimum(neg_cnt, jnp.floor(ohem_ratio * n_pos)),
                      jnp.float32(100.0))
    k_eff = jnp.minimum(n_neg, neg_cnt)
    # TODO(synk): OHEM top-k with data-dependent k has no clean Pallas
    # equivalent; done with jnp.sort in plain JAX on the kernel's per-pixel CE.
    ce_sorted = -jnp.sort(-ce_neg_vec)
    ranks = jnp.arange(ce_sorted.shape[0], dtype=jnp.float32)
    topk_sum = jnp.sum(jnp.where(ranks < k_eff, ce_sorted, 0.0))
    loss_tr = (loss_pos + topk_sum) / (n_pos + n_neg)

    safe_pos = jnp.maximum(n_pos, 1.0)
    safe_tcl_neg = jnp.maximum(tcl_neg_cnt, 1.0)
    loss_tcl = jnp.where(has_pos,
                         tcl_pos_sum / safe_pos + 0.5 * tcl_neg_sum / safe_tcl_neg,
                         jnp.float32(0.0))
    loss_x = jnp.where(has_pos, sx / (safe_pos * REC_LEN), jnp.float32(0.0))
    loss_y = jnp.where(has_pos, sy / (safe_pos * REC_LEN), jnp.float32(0.0))
    return loss_tr, loss_tcl, loss_x, loss_y


def wl_loss_forward(preds, p3_maps, p4_maps, p5_maps, Rt):
    """preds: list of 3 levels, each [cls (N,4,H,W), reg (N,42,H,W)] (NCHW)."""
    gts = [p3_maps, p4_maps, p5_maps]
    loss_tr = loss_tcl = loss_x = loss_y = jnp.float32(0.0)
    for (cls_pred, reg_pred), gt in zip(preds, gts):
        ce_neg, stats = _run_level_kernel(cls_pred, reg_pred, gt, Rt)
        ltr, ltcl, lx, ly = _combine_losses(stats, ce_neg)
        loss_tr = loss_tr + ltr
        loss_tcl = loss_tcl + ltcl
        loss_x = loss_x + lx
        loss_y = loss_y + ly
    return dict(loss_text=loss_tr, loss_center=loss_tcl,
                loss_x=loss_x, loss_y=loss_y)


# Pure-JAX reference (same math, no Pallas) used as a sanity check.
def wl_loss_forward_ref(preds, p3_maps, p4_maps, p5_maps, Rt):
    gts = [p3_maps, p4_maps, p5_maps]
    loss_tr = loss_tcl = loss_x = loss_y = jnp.float32(0.0)
    for (cls_pred, reg_pred), gt in zip(preds, gts):
        n, _, h, w = cls_pred.shape
        hw = h * w

        def cm(x):   # (N,C,H,W) -> channel-major (C, N*H*W)
            c = x.shape[1]
            return jnp.transpose(x.reshape(n, c, hw),
                                 (1, 0, 2)).reshape(c, n * hw).astype(jnp.float32)

        vb = jnp.ones((1, n * hw), dtype=bool)
        ce_neg, rows = _wl_math(cm(cls_pred), cm(reg_pred), cm(gt), vb, Rt)
        stats = jnp.stack([jnp.sum(r) for r in rows])
        ltr, ltcl, lx, ly = _combine_losses(stats, ce_neg.reshape(-1))
        loss_tr = loss_tr + ltr
        loss_tcl = loss_tcl + ltcl
        loss_x = loss_x + lx
        loss_y = loss_y + ly
    return dict(loss_text=loss_tr, loss_center=loss_tcl,
                loss_x=loss_x, loss_y=loss_y)


if __name__ == "__main__":
    key = jax.random.PRNGKey(0)
    N = 2
    level_hw = [16, 8, 4]         # p3 / p4 / p5 spatial sizes (small test shapes)
    Rt = build_waverec_matrix_t() # deterministic "parameters" (sym5 waverec matrix)

    preds, gts = [], []
    for hw in level_hw:
        key, k1, k2, k3, k4, k5, k6 = jax.random.split(key, 7)
        cls_pred = jax.random.normal(k1, (N, 4, hw, hw), jnp.float32)
        reg_pred = 0.5 * jax.random.normal(k2, (N, REG_C, hw, hw), jnp.float32)
        tr = (jax.random.uniform(k3, (N, 1, hw, hw)) < 0.3).astype(jnp.float32)
        tcl = (jax.random.uniform(k4, (N, 1, hw, hw)) < 0.2).astype(jnp.float32)
        train = (jax.random.uniform(k5, (N, 1, hw, hw)) < 0.9).astype(jnp.float32)
        coeffs = 0.5 * jax.random.normal(k6, (N, REG_C, hw, hw), jnp.float32)
        gt = jnp.concatenate([tr, tcl, train, coeffs], axis=1)   # (N, 45, hw, hw)
        preds.append([cls_pred, reg_pred])
        gts.append(gt)

    out = wl_loss_forward(preds, gts[0], gts[1], gts[2], Rt)
    out = {k: jax.block_until_ready(v) for k, v in out.items()}

    ref = wl_loss_forward_ref(preds, gts[0], gts[1], gts[2], Rt)
    for k in ("loss_text", "loss_center", "loss_x", "loss_y"):
        np.testing.assert_allclose(np.asarray(out[k]), np.asarray(ref[k]),
                                   rtol=5e-3, atol=5e-3)

    print("KERNEL_OK")
</pallas_src>

<mosaic_0001>
module attributes {stable_mosaic.version = 11 : i64} {
  func.func @kernel(%arg0: i32, %arg1: i32, %arg2: memref<1x4x256xf32, #tpu.memory_space<vmem>>, %arg3: memref<1x42x256xf32, #tpu.memory_space<vmem>>, %arg4: memref<1x45x256xf32, #tpu.memory_space<vmem>>, %arg5: memref<100x20xf32, #tpu.memory_space<vmem>>, %arg6: memref<1x1x1x256xf32, #tpu.memory_space<vmem>>, %arg7: memref<1x8x256xf32, #tpu.memory_space<vmem>>) attributes {dimension_semantics = [#tpu.dimension_semantics<parallel>, #tpu.dimension_semantics<arbitrary>], iteration_bounds = array<i64: 2, 1>, scalar_prefetch = 0 : i64, scratch_operands = 0 : i64, tpu.core_type = #tpu.core_type<tc>, window_params = [{transform_indices = @transform_0, window_bounds = array<i64: 1, 4, 256>}, {transform_indices = @transform_1, window_bounds = array<i64: 1, 42, 256>}, {transform_indices = @transform_2, window_bounds = array<i64: 1, 45, 256>}, {pipeline_mode = #tpu.pipeline_mode<synchronous>, transform_indices = @transform_3, window_bounds = array<i64: 100, 20>}, {transform_indices = @transform_4, window_bounds = array<i64: 1, 1, 1, 256>}, {transform_indices = @transform_5, window_bounds = array<i64: 1, 8, 256>}]} {
    %c0_i32 = arith.constant 0 : i32
    %0 = arith.cmpi eq, %arg1, %c0_i32 : i32
    %1 = arith.extui %0 : i1 to i32
    %c0_i32_0 = arith.constant 0 : i32
    %2 = arith.cmpi ne, %1, %c0_i32_0 : i32
    scf.if %2 {
      %cst_81 = arith.constant 0.000000e+00 : f32
      %175 = vector.broadcast %cst_81 : f32 to vector<8x256xf32>
      %c0_82 = arith.constant 0 : index
      %c0_83 = arith.constant 0 : index
      %c0_84 = arith.constant 0 : index
      %176 = vector.load %arg7[%c0_82, %c0_83, %c0_84] : memref<1x8x256xf32, #tpu.memory_space<vmem>>, vector<1x8x256xf32>
      %177 = vector.shape_cast %176 : vector<1x8x256xf32> to vector<8x256xf32>
      %178 = vector.shape_cast %175 : vector<8x256xf32> to vector<1x8x256xf32>
      tpu.vector_store %arg7[%c0_82, %c0_83, %c0_84], %178 {strides = array<i32>} : memref<1x8x256xf32, #tpu.memory_space<vmem>>, vector<1x8x256xf32>,
    } else {
    }
    %3 = tpu.iota {dimensions = array<i32: 1>} : vector<1x256xi32>
    %c256_i32 = arith.constant 256 : i32
    %4 = arith.muli %arg1, %c256_i32 : i32
    %5 = vector.broadcast %4 : i32 to vector<1x256xi32>
    %6 = arith.addi %5, %3 : vector<1x256xi32>
    %c256_i32_1 = arith.constant 256 : i32
    %7 = vector.broadcast %c256_i32_1 : i32 to vector<1x256xi32>
    %8 = arith.cmpi slt, %6, %7 : vector<1x256xi32>
    %c0 = arith.constant 0 : index
    %c0_2 = arith.constant 0 : index
    %c0_3 = arith.constant 0 : index
    %9 = vector.load %arg2[%c0, %c0_2, %c0_3] : memref<1x4x256xf32, #tpu.memory_space<vmem>>, vector<1x4x256xf32>
    %10 = vector.shape_cast %9 : vector<1x4x256xf32> to vector<4x256xf32>
    %c0_4 = arith.constant 0 : index
    %c0_5 = arith.constant 0 : index
    %c0_6 = arith.constant 0 : index
    %11 = vector.load %arg3[%c0_4, %c0_5, %c0_6] : memref<1x42x256xf32, #tpu.memory_space<vmem>>, vector<1x42x256xf32>
    %12 = vector.shape_cast %11 : vector<1x42x256xf32> to vector<42x256xf32>
    %c0_7 = arith.constant 0 : index
    %c0_8 = arith.constant 0 : index
    %c0_9 = arith.constant 0 : index
    %13 = vector.load %arg4[%c0_7, %c0_8, %c0_9] : memref<1x45x256xf32, #tpu.memory_space<vmem>>, vector<1x45x256xf32>
    %14 = vector.shape_cast %13 : vector<1x45x256xf32> to vector<45x256xf32>
    %c0_10 = arith.constant 0 : index
    %c0_11 = arith.constant 0 : index
    %15 = vector.load %arg5[%c0_10, %c0_11] : memref<100x20xf32, #tpu.memory_space<vmem>>, vector<100x20xf32>
    %16 = arith.extui %8 : vector<1x256xi1> to vector<1x256xi32>
    %17 = arith.sitofp %16 : vector<1x256xi32> to vector<1x256xf32>
    %18 = vector.extract_strided_slice %14 {offsets = [0, 0], sizes = [1, 256], strides = [1, 1]} : vector<45x256xf32> to vector<1x256xf32>
    %cst = arith.constant 0.000000e+00 : f32
    %19 = vector.broadcast %cst : f32 to vector<1x256xf32>
    %20 = arith.select %8, %18, %19 : vector<1x256xi1>, vector<1x256xf32>
    %21 = vector.extract_strided_slice %14 {offsets = [1, 0], sizes = [1, 256], strides = [1, 1]} : vector<45x256xf32> to vector<1x256xf32>
    %cst_12 = arith.constant 0.000000e+00 : f32
    %22 = vector.broadcast %cst_12 : f32 to vector<1x256xf32>
    %23 = arith.select %8, %21, %22 : vector<1x256xi1>, vector<1x256xf32>
    %24 = vector.extract_strided_slice %14 {offsets = [2, 0], sizes = [1, 256], strides = [1, 1]} : vector<45x256xf32> to vector<1x256xf32>
    %cst_13 = arith.constant 0.000000e+00 : f32
    %25 = vector.broadcast %cst_13 : f32 to vector<1x256xf32>
    %26 = arith.select %8, %24, %25 : vector<1x256xi1>, vector<1x256xf32>
    %27 = vector.extract_strided_slice %10 {offsets = [0, 0], sizes = [1, 256], strides = [1, 1]} : vector<4x256xf32> to vector<1x256xf32>
    %28 = vector.extract_strided_slice %10 {offsets = [1, 0], sizes = [1, 256], strides = [1, 1]} : vector<4x256xf32> to vector<1x256xf32>
    %29 = vector.extract_strided_slice %10 {offsets = [2, 0], sizes = [1, 256], strides = [1, 1]} : vector<4x256xf32> to vector<1x256xf32>
    %30 = vector.extract_strided_slice %10 {offsets = [3, 0], sizes = [1, 256], strides = [1, 1]} : vector<4x256xf32> to vector<1x256xf32>
    %31 = arith.maximumf %27, %28 : vector<1x256xf32>
    %32 = arith.subf %27, %28 : vector<1x256xf32>
    %33 = math.absf %32 : vector<1x256xf32>
    %cst_14 = arith.constant 0.000000e+00 : f32
    %34 = vector.broadcast %cst_14 : f32 to vector<1x256xf32>
    %35 = arith.subf %34, %33 : vector<1x256xf32>
    %36 = math.exp %35 : vector<1x256xf32>
    %cst_15 = arith.constant 1.000000e+00 : f32
    %37 = vector.broadcast %cst_15 : f32 to vector<1x256xf32>
    %38 = arith.addf %37, %36 : vector<1x256xf32>
    %39 = math.log %38 : vector<1x256xf32>
    %40 = arith.addf %31, %39 : vector<1x256xf32>
    %cst_16 = arith.constant 1.000000e+00 : f32
    %41 = vector.broadcast %cst_16 : f32 to vector<1x256xf32>
    %42 = arith.subf %41, %20 : vector<1x256xf32>
    %43 = arith.mulf %27, %42 : vector<1x256xf32>
    %44 = arith.mulf %28, %20 : vector<1x256xf32>
    %45 = arith.addf %43, %44 : vector<1x256xf32>
    %46 = arith.subf %40, %45 : vector<1x256xf32>
    %cst_17 = arith.constant 0.000000e+00 : f32
    %47 = vector.broadcast %cst_17 : f32 to vector<1x256xf32>
    %48 = arith.select %8, %46, %47 : vector<1x256xi1>, vector<1x256xf32>
    %49 = arith.maximumf %29, %30 : vector<1x256xf32>
    %50 = arith.subf %29, %30 : vector<1x256xf32>
    %51 = math.absf %50 : vector<1x256xf32>
    %cst_18 = arith.constant 0.000000e+00 : f32
    %52 = vector.broadcast %cst_18 : f32 to vector<1x256xf32>
    %53 = arith.subf %52, %51 : vector<1x256xf32>
    %54 = math.exp %53 : vector<1x256xf32>
    %cst_19 = arith.constant 1.000000e+00 : f32
    %55 = vector.broadcast %cst_19 : f32 to vector<1x256xf32>
    %56 = arith.addf %55, %54 : vector<1x256xf32>
    %57 = math.log %56 : vector<1x256xf32>
    %58 = arith.addf %49, %57 : vector<1x256xf32>
    %cst_20 = arith.constant 1.000000e+00 : f32
    %59 = vector.broadcast %cst_20 : f32 to vector<1x256xf32>
    %60 = arith.subf %59, %23 : vector<1x256xf32>
    %61 = arith.mulf %29, %60 : vector<1x256xf32>
    %62 = arith.mulf %30, %23 : vector<1x256xf32>
    %63 = arith.addf %61, %62 : vector<1x256xf32>
    %64 = arith.subf %58, %63 : vector<1x256xf32>
    %cst_21 = arith.constant 0.000000e+00 : f32
    %65 = vector.broadcast %cst_21 : f32 to vector<1x256xf32>
    %66 = arith.select %8, %64, %65 : vector<1x256xi1>, vector<1x256xf32>
    %67 = arith.mulf %20, %26 : vector<1x256xf32>
    %cst_22 = arith.constant 1.000000e+00 : f32
    %68 = vector.broadcast %cst_22 : f32 to vector<1x256xf32>
    %69 = arith.subf %68, %20 : vector<1x256xf32>
    %70 = arith.mulf %69, %26 : vector<1x256xf32>
    %cst_23 = arith.constant 1.000000e+00 : f32
    %71 = vector.broadcast %cst_23 : f32 to vector<1x256xf32>
    %72 = arith.subf %71, %67 : vector<1x256xf32>
    %73 = arith.mulf %72, %17 : vector<1x256xf32>
    %74 = vector.extract_strided_slice %12 {offsets = [0, 0], sizes = [20, 256], strides = [1, 1]} : vector<42x256xf32> to vector<20x256xf32>
    %75 = vector.extract_strided_slice %14 {offsets = [3, 0], sizes = [20, 256], strides = [1, 1]} : vector<45x256xf32> to vector<20x256xf32>
    %76 = arith.subf %74, %75 : vector<20x256xf32>
    %77 = vector.extract_strided_slice %12 {offsets = [21, 0], sizes = [20, 256], strides = [1, 1]} : vector<42x256xf32> to vector<20x256xf32>
    %78 = vector.extract_strided_slice %14 {offsets = [24, 0], sizes = [20, 256], strides = [1, 1]} : vector<45x256xf32> to vector<20x256xf32>
    %79 = arith.subf %77, %78 : vector<20x256xf32>
    %80 = vector.extract_strided_slice %12 {offsets = [20, 0], sizes = [1, 256], strides = [1, 1]} : vector<42x256xf32> to vector<1x256xf32>
    %81 = vector.extract_strided_slice %14 {offsets = [23, 0], sizes = [1, 256], strides = [1, 1]} : vector<45x256xf32> to vector<1x256xf32>
    %82 = arith.subf %80, %81 : vector<1x256xf32>
    %83 = vector.extract_strided_slice %12 {offsets = [41, 0], sizes = [1, 256], strides = [1, 1]} : vector<42x256xf32> to vector<1x256xf32>
    %84 = vector.extract_strided_slice %14 {offsets = [44, 0], sizes = [1, 256], strides = [1, 1]} : vector<45x256xf32> to vector<1x256xf32>
    %85 = arith.subf %83, %84 : vector<1x256xf32>
    %cst_24 = arith.constant dense<0.000000e+00> : vector<100x256xf32>
    %86 = tpu.matmul %15, %76, %cst_24 {dimension_numbers = #tpu.dot_dimension_numbers<[1], [0], [0], [1], [0, 0, 1, 1], [], []>} : vector<100x20xf32>, vector<20x256xf32>, vector<100x256xf32> -> vector<100x256xf32>
    %87 = vector.broadcast %82 : vector<1x256xf32> to vector<100x256xf32>
    %88 = arith.addf %86, %87 : vector<100x256xf32>
    %cst_25 = arith.constant dense<0.000000e+00> : vector<100x256xf32>
    %89 = tpu.matmul %15, %79, %cst_25 {dimension_numbers = #tpu.dot_dimension_numbers<[1], [0], [0], [1], [0, 0, 1, 1], [], []>} : vector<100x20xf32>, vector<20x256xf32>, vector<100x256xf32> -> vector<100x256xf32>
    %90 = vector.broadcast %85 : vector<1x256xf32> to vector<100x256xf32>
    %91 = arith.addf %89, %90 : vector<100x256xf32>
    %92 = math.absf %88 : vector<100x256xf32>
    %93 = math.absf %91 : vector<100x256xf32>
    %cst_26 = arith.constant 1.000000e+00 : f32
    %94 = vector.broadcast %cst_26 : f32 to vector<100x256xf32>
    %95 = arith.cmpf olt, %92, %94 : vector<100x256xf32>
    %cst_27 = arith.constant 5.000000e-01 : f32
    %96 = vector.broadcast %cst_27 : f32 to vector<100x256xf32>
    %97 = arith.mulf %96, %92 : vector<100x256xf32>
    %98 = arith.mulf %97, %92 : vector<100x256xf32>
    %cst_28 = arith.constant 5.000000e-01 : f32
    %99 = vector.broadcast %cst_28 : f32 to vector<100x256xf32>
    %100 = arith.subf %92, %99 : vector<100x256xf32>
    %101 = arith.select %95, %98, %100 : vector<100x256xi1>, vector<100x256xf32>
    %cst_29 = arith.constant 1.000000e+00 : f32
    %102 = vector.broadcast %cst_29 : f32 to vector<100x256xf32>
    %103 = arith.cmpf olt, %93, %102 : vector<100x256xf32>
    %cst_30 = arith.constant 5.000000e-01 : f32
    %104 = vector.broadcast %cst_30 : f32 to vector<100x256xf32>
    %105 = arith.mulf %104, %93 : vector<100x256xf32>
    %106 = arith.mulf %105, %93 : vector<100x256xf32>
    %cst_31 = arith.constant 5.000000e-01 : f32
    %107 = vector.broadcast %cst_31 : f32 to vector<100x256xf32>
    %108 = arith.subf %93, %107 : vector<100x256xf32>
    %109 = arith.select %103, %106, %108 : vector<100x256xi1>, vector<100x256xf32>
    %cst_32 = arith.constant dense<0.000000e+00> : vector<256xf32>
    %110 = vector.multi_reduction <add>, %101, %cst_32 [0] : vector<100x256xf32> to vector<256xf32>
    %111 = vector.shape_cast %110 : vector<256xf32> to vector<1x256xf32>
    %cst_33 = arith.constant 0.000000e+00 : f32
    %112 = vector.broadcast %cst_33 : f32 to vector<1x256xf32>
    %113 = arith.select %8, %111, %112 : vector<1x256xi1>, vector<1x256xf32>
    %cst_34 = arith.constant dense<0.000000e+00> : vector<256xf32>
    %114 = vector.multi_reduction <add>, %109, %cst_34 [0] : vector<100x256xf32> to vector<256xf32>
    %115 = vector.shape_cast %114 : vector<256xf32> to vector<1x256xf32>
    %cst_35 = arith.constant 0.000000e+00 : f32
    %116 = vector.broadcast %cst_35 : f32 to vector<1x256xf32>
    %117 = arith.select %8, %115, %116 : vector<1x256xi1>, vector<1x256xf32>
    %118 = arith.mulf %48, %70 : vector<1x256xf32>
    %119 = arith.mulf %67, %48 : vector<1x256xf32>
    %120 = arith.mulf %67, %66 : vector<1x256xf32>
    %121 = arith.mulf %73, %66 : vector<1x256xf32>
    %122 = arith.mulf %67, %113 : vector<1x256xf32>
    %123 = arith.mulf %67, %117 : vector<1x256xf32>
    %c0_36 = arith.constant 0 : index
    %c0_37 = arith.constant 0 : index
    %c0_38 = arith.constant 0 : index
    %c0_39 = arith.constant 0 : index
    %124 = vector.load %arg6[%c0_36, %c0_37, %c0_38, %c0_39] : memref<1x1x1x256xf32, #tpu.memory_space<vmem>>, vector<1x1x1x256xf32>
    %125 = vector.shape_cast %124 : vector<1x1x1x256xf32> to vector<1x256xf32>
    %126 = vector.shape_cast %118 : vector<1x256xf32> to vector<1x1x1x256xf32>
    tpu.vector_store %arg6[%c0_36, %c0_37, %c0_38, %c0_39], %126 {strides = array<i32>} : memref<1x1x1x256xf32, #tpu.memory_space<vmem>>, vector<1x1x1x256xf32>,
    %c0_40 = arith.constant 0 : index
    %c0_41 = arith.constant 0 : index
    %c0_42 = arith.constant 0 : index
    %127 = vector.load %arg7[%c0_40, %c0_41, %c0_42] : memref<1x8x256xf32, #tpu.memory_space<vmem>>, vector<1x1x256xf32>
    %128 = vector.shape_cast %127 : vector<1x1x256xf32> to vector<1x256xf32>
    %129 = arith.addf %128, %67 : vector<1x256xf32>
    %c0_43 = arith.constant 0 : index
    %c0_44 = arith.constant 0 : index
    %c0_45 = arith.constant 0 : index
    %130 = vector.load %arg7[%c0_43, %c0_44, %c0_45] : memref<1x8x256xf32, #tpu.memory_space<vmem>>, vector<1x1x256xf32>
    %131 = vector.shape_cast %130 : vector<1x1x256xf32> to vector<1x256xf32>
    %132 = vector.shape_cast %129 : vector<1x256xf32> to vector<1x1x256xf32>
    tpu.vector_store %arg7[%c0_43, %c0_44, %c0_45], %132 {strides = array<i32>} : memref<1x8x256xf32, #tpu.memory_space<vmem>>, vector<1x1x256xf32>,
    %c0_46 = arith.constant 0 : index
    %c1 = arith.constant 1 : index
    %c0_47 = arith.constant 0 : index
    %133 = vector.load %arg7[%c0_46, %c1, %c0_47] : memref<1x8x256xf32, #tpu.memory_space<vmem>>, vector<1x1x256xf32>
    %134 = vector.shape_cast %133 : vector<1x1x256xf32> to vector<1x256xf32>
    %135 = arith.addf %134, %70 : vector<1x256xf32>
    %c0_48 = arith.constant 0 : index
    %c1_49 = arith.constant 1 : index
    %c0_50 = arith.constant 0 : index
    %136 = vector.load %arg7[%c0_48, %c1_49, %c0_50] : memref<1x8x256xf32, #tpu.memory_space<vmem>>, vector<1x1x256xf32>
    %137 = vector.shape_cast %136 : vector<1x1x256xf32> to vector<1x256xf32>
    %138 = vector.shape_cast %135 : vector<1x256xf32> to vector<1x1x256xf32>
    tpu.vector_store %arg7[%c0_48, %c1_49, %c0_50], %138 {strides = array<i32>} : memref<1x8x256xf32, #tpu.memory_space<vmem>>, vector<1x1x256xf32>,
    %c0_51 = arith.constant 0 : index
    %c2 = arith.constant 2 : index
    %c0_52 = arith.constant 0 : index
    %139 = vector.load %arg7[%c0_51, %c2, %c0_52] : memref<1x8x256xf32, #tpu.memory_space<vmem>>, vector<1x1x256xf32>
    %140 = vector.shape_cast %139 : vector<1x1x256xf32> to vector<1x256xf32>
    %141 = arith.addf %140, %119 : vector<1x256xf32>
    %c0_53 = arith.constant 0 : index
    %c2_54 = arith.constant 2 : index
    %c0_55 = arith.constant 0 : index
    %142 = vector.load %arg7[%c0_53, %c2_54, %c0_55] : memref<1x8x256xf32, #tpu.memory_space<vmem>>, vector<1x1x256xf32>
    %143 = vector.shape_cast %142 : vector<1x1x256xf32> to vector<1x256xf32>
    %144 = vector.shape_cast %141 : vector<1x256xf32> to vector<1x1x256xf32>
    tpu.vector_store %arg7[%c0_53, %c2_54, %c0_55], %144 {strides = array<i32>} : memref<1x8x256xf32, #tpu.memory_space<vmem>>, vector<1x1x256xf32>,
    %c0_56 = arith.constant 0 : index
    %c3 = arith.constant 3 : index
    %c0_57 = arith.constant 0 : index
    %145 = vector.load %arg7[%c0_56, %c3, %c0_57] : memref<1x8x256xf32, #tpu.memory_space<vmem>>, vector<1x1x256xf32>
    %146 = vector.shape_cast %145 : vector<1x1x256xf32> to vector<1x256xf32>
    %147 = arith.addf %146, %120 : vector<1x256xf32>
    %c0_58 = arith.constant 0 : index
    %c3_59 = arith.constant 3 : index
    %c0_60 = arith.constant 0 : index
    %148 = vector.load %arg7[%c0_58, %c3_59, %c0_60] : memref<1x8x256xf32, #tpu.memory_space<vmem>>, vector<1x1x256xf32>
    %149 = vector.shape_cast %148 : vector<1x1x256xf32> to vector<1x256xf32>
    %150 = vector.shape_cast %147 : vector<1x256xf32> to vector<1x1x256xf32>
    tpu.vector_store %arg7[%c0_58, %c3_59, %c0_60], %150 {strides = array<i32>} : memref<1x8x256xf32, #tpu.memory_space<vmem>>, vector<1x1x256xf32>,
    %c0_61 = arith.constant 0 : index
    %c4 = arith.constant 4 : index
    %c0_62 = arith.constant 0 : index
    %151 = vector.load %arg7[%c0_61, %c4, %c0_62] : memref<1x8x256xf32, #tpu.memory_space<vmem>>, vector<1x1x256xf32>
    %152 = vector.shape_cast %151 : vector<1x1x256xf32> to vector<1x256xf32>
    %153 = arith.addf %152, %121 : vector<1x256xf32>
    %c0_63 = arith.constant 0 : index
    %c4_64 = arith.constant 4 : index
    %c0_65 = arith.constant 0 : index
    %154 = vector.load %arg7[%c0_63, %c4_64, %c0_65] : memref<1x8x256xf32, #tpu.memory_space<vmem>>, vector<1x1x256xf32>
    %155 = vector.shape_cast %154 : vector<1x1x256xf32> to vector<1x256xf32>
    %156 = vector.shape_cast %153 : vector<1x256xf32> to vector<1x1x256xf32>
    tpu.vector_store %arg7[%c0_63, %c4_64, %c0_65], %156 {strides = array<i32>} : memref<1x8x256xf32, #tpu.memory_space<vmem>>, vector<1x1x256xf32>,
    %c0_66 = arith.constant 0 : index
    %c5 = arith.constant 5 : index
    %c0_67 = arith.constant 0 : index
    %157 = vector.load %arg7[%c0_66, %c5, %c0_67] : memref<1x8x256xf32, #tpu.memory_space<vmem>>, vector<1x1x256xf32>
    %158 = vector.shape_cast %157 : vector<1x1x256xf32> to vector<1x256xf32>
    %159 = arith.addf %158, %73 : vector<1x256xf32>
    %c0_68 = arith.constant 0 : index
    %c5_69 = arith.constant 5 : index
    %c0_70 = arith.constant 0 : index
    %160 = vector.load %arg7[%c0_68, %c5_69, %c0_70] : memref<1x8x256xf32, #tpu.memory_space<vmem>>, vector<1x1x256xf32>
    %161 = vector.shape_cast %160 : vector<1x1x256xf32> to vector<1x256xf32>
    %162 = vector.shape_cast %159 : vector<1x256xf32> to vector<1x1x256xf32>
    tpu.vector_store %arg7[%c0_68, %c5_69, %c0_70], %162 {strides = array<i32>} : memref<1x8x256xf32, #tpu.memory_space<vmem>>, vector<1x1x256xf32>,
    %c0_71 = arith.constant 0 : index
    %c6 = arith.constant 6 : index
    %c0_72 = arith.constant 0 : index
    %163 = vector.load %arg7[%c0_71, %c6, %c0_72] : memref<1x8x256xf32, #tpu.memory_space<vmem>>, vector<1x1x256xf32>
    %164 = vector.shape_cast %163 : vector<1x1x256xf32> to vector<1x256xf32>
    %165 = arith.addf %164, %122 : vector<1x256xf32>
    %c0_73 = arith.constant 0 : index
    %c6_74 = arith.constant 6 : index
    %c0_75 = arith.constant 0 : index
    %166 = vector.load %arg7[%c0_73, %c6_74, %c0_75] : memref<1x8x256xf32, #tpu.memory_space<vmem>>, vector<1x1x256xf32>
    %167 = vector.shape_cast %166 : vector<1x1x256xf32> to vector<1x256xf32>
    %168 = vector.shape_cast %165 : vector<1x256xf32> to vector<1x1x256xf32>
    tpu.vector_store %arg7[%c0_73, %c6_74, %c0_75], %168 {strides = array<i32>} : memref<1x8x256xf32, #tpu.memory_space<vmem>>, vector<1x1x256xf32>,
    %c0_76 = arith.constant 0 : index
    %c7 = arith.constant 7 : index
    %c0_77 = arith.constant 0 : index
    %169 = vector.load %arg7[%c0_76, %c7, %c0_77] : memref<1x8x256xf32, #tpu.memory_space<vmem>>, vector<1x1x256xf32>
    %170 = vector.shape_cast %169 : vector<1x1x256xf32> to vector<1x256xf32>
    %171 = arith.addf %170, %123 : vector<1x256xf32>
    %c0_78 = arith.constant 0 : index
    %c7_79 = arith.constant 7 : index
    %c0_80 = arith.constant 0 : index
    %172 = vector.load %arg7[%c0_78, %c7_79, %c0_80] : memref<1x8x256xf32, #tpu.memory_space<vmem>>, vector<1x1x256xf32>
    %173 = vector.shape_cast %172 : vector<1x1x256xf32> to vector<1x256xf32>
    %174 = vector.shape_cast %171 : vector<1x256xf32> to vector<1x1x256xf32>
    tpu.vector_store %arg7[%c0_78, %c7_79, %c0_80], %174 {strides = array<i32>} : memref<1x8x256xf32, #tpu.memory_space<vmem>>, vector<1x1x256xf32>,
    return
  }
  func.func @transform_0(%arg0: i32, %arg1: i32) -> (i32, i32, i32) {
    %c0_i32 = arith.constant 0 : i32
    %c0_i32_0 = arith.constant 0 : i32
    return %arg0, %c0_i32, %arg1 : i32, i32, i32
  }
  func.func @transform_1(%arg0: i32, %arg1: i32) -> (i32, i32, i32) {
    %c0_i32 = arith.constant 0 : i32
    %c0_i32_0 = arith.constant 0 : i32
    return %arg0, %c0_i32, %arg1 : i32, i32, i32
  }
  func.func @transform_2(%arg0: i32, %arg1: i32) -> (i32, i32, i32) {
    %c0_i32 = arith.constant 0 : i32
    %c0_i32_0 = arith.constant 0 : i32
    return %arg0, %c0_i32, %arg1 : i32, i32, i32
  }
  func.func @transform_3(%arg0: i32, %arg1: i32) -> (i32, i32) {
    %c0_i32 = arith.constant 0 : i32
    %c0_i32_0 = arith.constant 0 : i32
    %c0_i32_1 = arith.constant 0 : i32
    return %c0_i32, %c0_i32_0 : i32, i32
  }
  func.func @transform_4(%arg0: i32, %arg1: i32) -> (i32, i32, i32, i32) {
    %c0_i32 = arith.constant 0 : i32
    %c0_i32_0 = arith.constant 0 : i32
    %c0_i32_1 = arith.constant 0 : i32
    return %arg0, %arg1, %c0_i32, %c0_i32_0 : i32, i32, i32, i32
  }
  func.func @transform_5(%arg0: i32, %arg1: i32) -> (i32, i32, i32) {
    %c0_i32 = arith.constant 0 : i32
    %c0_i32_0 = arith.constant 0 : i32
    %c0_i32_1 = arith.constant 0 : i32
    return %arg0, %c0_i32, %c0_i32_0 : i32, i32, i32
  }
}

</mosaic_0001>

<bundles_post_ra>
// kernel: tpu_custom_call.1
= control target key start
LH: loop header
LB: loop body
LE: loop exit
PB: predicated region body
PF: predicated region fallthrough
CT: control target
= control target key end

     0   :  { %11 = vsyncpa [#allocation3], 0  ;;  %s2339_s0 = inlined_call_operand.vmem [shape: f32[2,4,256], index: 0, kind: input, shape index: {}]   ;;  %s2340_s1 = inlined_call_operand.vmem [shape: f32[2,42,256], index: 1, kind: input, shape index: {}]   ;;  %s2341_s2 = inlined_call_operand.vmem [shape: f32[2,45,256], index: 2, kind: input, shape index: {}]   ;;  %s2342_s3 = inlined_call_operand.vmem [shape: f32[100,20], index: 3, kind: input, shape index: {}]   ;;  %s2343_s4 = inlined_call_operand.hbm [shape: f32[2,1,1,256], index: 4, kind: output, shape index: {0}]   ;;  %s2344_s5 = inlined_call_operand.hbm [shape: f32[2,8,256], index: 5, kind: output, shape index: {1}]  }
   0x1   :  { %13 = vsyncpa [#allocation3 + $0x1], 0 }
   0x2   :  { %14 = vsyncpa [#allocation5], 0 }
   0x3   :  { %16 = vsyncpa [#allocation5 + $0x1], 0  ;;  %s1866_s18 = smov 0   ;;  %s1868_s19 = smov 0  }
   0x4   :  { %s1870_s20 = smov 0   ;;  %s1872_s21 = smov 0  }
   0x5   :  { %s1874_s22 = smov 0   ;;  %s1876_s23 = smov 0  }
   0x6 LB: > { %s1511_s24 = sadd.s32 4294967295, %s1833_s23   ;;  %s1512_s25 = sadd.s32 4294967294, %s1833_s23   ;;  %s1833_s23 = sphi %s1876_s23, %s22_s23   ;;  %s1829_s22 = sphi %s1874_s22, %s2353_s22   ;;  %s1825_s21 = sphi %s1872_s21, %s2352_s21   ;;  %s1821_s20 = sphi %s1870_s20, %s2351_s20   ;;  %s1817_s19 = sphi %s1868_s19, %s2350_s19   ;;  %s1813_s18 = sphi %s1866_s18, %s2349_s18  }
   0x7   : > { %s34_s26 = sadd.s32 1, %s1829_s22  ;;  %s148_s27 = sadd.s32 1, %s1821_s20 }
   0x8   : > { %p36_p0 = scmp.ge.s32.totalorder %s34_s26, 2  ;;  %p158_p1 = scmp.ne.s32.totalorder %s1821_s20, %s1817_s19 }
   0x9   : > { %p159_p2 = scmp.eq.s32.totalorder %s1511_s24, 1  ;;  %p164_p3 = scmp.ne.s32.totalorder %s1817_s19, %s1813_s18 }
   0xa   : > { %s2355_s26 = smov (%p36_p0, %s34_s26), 0  ;;  %p165_p5 = scmp.eq.s32.totalorder %s1512_s25, 1 }
   0xb   : > { %p1906_p4 = por %p159_p2, %p158_p1  ;;  %s143_s29 = ssub.s32 %s1829_s22, %s2355_s26 }
   0xc   : > { %p1515_p6 = scmp.ge.s32.totalorder %s1833_s23, 1  ;;  %p146_p7 = scmp.eq.s32.totalorder %s143_s29, 0 }
   0xd   : > { %p1913_p8 = por %p165_p5, %p164_p3  ;;  %p251_p9 = scmp.lt.s32.totalorder %s1833_s23, 3 }
   0xe   : > { %s1919_s6 = scalar_select %p146_p7, %s1821_s20, %s148_s27  }
   0xf   : > { %p252_p10 = pnand %p1515_p6, %p251_p9 }
  0x10   : > { %p307_p11 = scmp.lt.s32.totalorder (!%p252_p10), %s1825_s21, 1  ;;  %s2164_s24 = sand.u32 (!%p252_p10), 1, %s1817_s19  }
  0x11   : > { %255 = sbr.rel (%p252_p10) target bundleno = 329 (0x149), region = 36  ;;  %s1517_s25 = sshll.u32 (!%p252_p10), %s2164_s24, 4 }
  0x12   : > { %s2175_s27 = scalar_lea.vmem (!%p252_p10), [#allocation4], %s1517_s25  ;;  %s1648_s29 = sshll.u32 (!%p252_p10), %s1825_s21, 1 }
  0x13   : > { %s1347_s10 = scalar_lea.hbm (!%p252_p10), %s2343_s4, %s1648_s29 }
  0x16   : > { %s1923_s7 = scalar_select %p307_p11, %s1825_s21, 1  ;;  %vm414_vm0 = vcmask 1043456   ;;  %vm475_vm1 = vcmask 1044480   ;;  %vm532_vm2 = vcmask 162816   ;;  %v376_v30 = vld [vmem:[%s2342_s3] sm:$0xff]  ;;  %vm700_vm3 = vcmask 1042432  }
  0x18   : > { %s1655_s8 = smul.u32 96, %s1923_s7  ;;  %s1653_s15 = sshll.u32 %s1923_s7, 3 }
  0x19   : > { %s314_s7 = scalar_lea.vmem %s2339_s0, %s1653_s15  ;;  %s1351_s15 = sshll.u32 %s1347_s10, 4  ;;  %s1352_s15 = int_to_ptr.hbm [resolvable:$true] %s1351_s15 }
  0x1a   : > { %s1929_s11 = scalar_lea.vmem %s2340_s1, %s1655_s8  ;;  %s1934_s14 = scalar_lea.vmem %s2341_s2, %s1655_s8 }
  0x1b   : > { %v356_v0 = vld [vmem:[%s1929_s11 + $0x20] sm:$0xff]  ;;  %v357_v3 = vld [vmem:[%s1929_s11 + $0x28] sm:$0xff]  ;;  %v370_v5 = vld [vmem:[%s1934_s14 + $0x30] sm:$0xff]  ;;  %s1737_s29 = sshra.s32 %s1352_s15, 4  ;;  %s1738_s29 = int_to_ptr.hbm [resolvable:$true] %s1737_s29 }
  0x1c   : > { %v368_v1 = vld [vmem:[%s1934_s14 + $0x20] sm:$0xff]  ;;  %v369_v4 = vld [vmem:[%s1934_s14 + $0x28] sm:$0xff]  ;;  %v1942_v6 = vld [vmem:[%s1934_s14 + $0x38] sm:$0xff]  ;;  %v504_v19 = vrot.slane %v370_v5, 3  ;;  %s1739_s8 = scalar_lea.hbm %s1738_s29, 2  ;;  %p1744_p1 = scmp.lt.s32.totalorder %s1738_s29, %s2343_s4 }
  0x1d   : > { %v482_v2 = vrot.slane %v368_v1, 3  ;;  %v484_v7 = vrot.slane %v369_v4, 3  ;;  %v366_v8 = vld [vmem:[%s1934_s14 + $0x10] sm:$0xff]  ;;  %v367_v12 = vld [vmem:[%s1934_s14 + $0x18] sm:$0xff]  ;;  %v364_v13 = vld [vmem:[%s1934_s14] sm:$0xff]  ;;  %v505_v24 = vrot.slane %v1942_v6, 3  ;;  %p1740_p12 = scmp.ne.s32.totalorder %s1738_s29, %s1739_s8 }
  0x1e   : > { %v354_v10 = vld [vmem:[%s1929_s11 + $0x10] sm:$0xff]  ;;  %v477_v11 = vrot.slane %v366_v8, 3  ;;  %v355_v15 = vld [vmem:[%s1929_s11 + $0x18] sm:$0xff]  ;;  %v480_v16 = vrot.slane %v367_v12, 3  ;;  %v476_v17 = vrot.slane %v364_v13, 3  ;;  %v365_v18 = vld [vmem:[%s1934_s14 + $0x8] sm:$0xff]  ;;  %v522_v44 = vsub.f32 %v356_v0, %v504_v19 }
  0x1f   : > { %v1945_v9 = vsub.f32 %v356_v0, %v482_v2  ;;  %v1950_v14 = vsub.f32 %v357_v3, %v484_v7  ;;  %v352_v21 = vld [vmem:[%s1929_s11] sm:$0xff]  ;;  %v353_v22 = vld [vmem:[%s1929_s11 + $0x8] sm:$0xff]  ;;  %v362_v27 = vld [vmem:[%s1929_s11 + $0x50] sm:$0x3]  ;;  %v479_v33 = vrot.slane %v365_v18, 3  ;;  %v523_v45 = vsub.f32 %v357_v3, %v505_v24  ;;  %p1741_p13 = pnand %p1740_p12, %p1906_p4 }
  0x20   : > { %v483_v20 = vsel %vm475_vm1, %v477_v11, %v482_v2  ;;  %v372_v23 = vld [vmem:[%s1934_s14 + $0x40] sm:$0xff]  ;;  %v485_v26 = vsel %vm475_vm1, %v480_v16, %v484_v7  ;;  %v374_v28 = vld [vmem:[%s1934_s14 + $0x50] sm:$0x1f]  ;;  %v373_v29 = vld [vmem:[%s1934_s14 + $0x48] sm:$0xff]  ;;  %v478_v32 = vsel %vm475_vm1, %v476_v17, %v477_v11  ;;  %v701_v59 = vrot.slane %v522_v44, 5 }
  0x21   : > { %1524 = vmatpush.msk.msra.mxu0 %vm414_vm0, %v1945_v9  ;;  %1538 = vmatpush.msk.msra.mxu1 %vm414_vm0, %v1950_v14  ;;  %v494_v25 = vsub.f32 %v354_v10, %v483_v20  ;;  %v495_v31 = vsub.f32 %v355_v15, %v485_v26  ;;  %v360_v34 = vld [vmem:[%s1929_s11 + $0x40] sm:$0xff]  ;;  %v506_v35 = vrot.slane %v372_v23, 3  ;;  %v361_v36 = vld [vmem:[%s1929_s11 + $0x48] sm:$0xff]  ;;  %v375_v37 = vld [vmem:[%s1934_s14 + $0x58] sm:$0x1f]  ;;  %v492_v38 = vsub.f32 %v352_v21, %v478_v32  ;;  %p1742_p0 = pneg %p1741_p13 }
  0x22   : > { %v510_v39 = vrot.slane %v374_v28, 3  ;;  %v363_v40 = vld [vmem:[%s1929_s11 + $0x58] sm:$0x3]  ;;  %v508_v41 = vrot.slane %v373_v29, 3  ;;  %v512_v42 = vrot.slane %v375_v37, 3  ;;  %v358_v43 = vld [vmem:[%s1929_s11 + $0x30] sm:$0xff]  ;;  %v481_v46 = vsel %vm475_vm1, %v479_v33, %v480_v16 }
  0x23   : > { %592 = vmatpush.msra.mxu0 %v494_v25  ;;  %648 = vmatpush.msra.mxu1 %v495_v31  ;;  %v507_v47 = vsel %vm475_vm1, %v504_v19, %v506_v35  ;;  %v493_v48 = vsub.f32 %v353_v22, %v481_v46  ;;  %v359_v56 = vld [vmem:[%s1929_s11 + $0x38] sm:$0xff]  ;;  %v704_v63 = vrot.slane %v523_v45, 5  ;;  %v377_v6 = vld [vmem:[%s2342_s3 + $0x8] sm:$0xff]  ;;  %v378_v11 = vld [vmem:[%s2342_s3 + $0x10] sm:$0xff]  ;;  %v2085_v23 = vperm.slane %v1945_v9, 4  ;;  %s1654_s11 = sshll.u32 %s1825_s21, 4 }
  0x24   : > { %v511_v49 = vsel %vm475_vm1, %v506_v35, %v510_v39  ;;  %v1979_v50 = vsub.f32 %v362_v27, %v510_v39  ;;  %v513_v51 = vsel %vm475_vm1, %v508_v41, %v512_v42  ;;  %v1982_v54 = vsub.f32 %v363_v40, %v512_v42  ;;  %v379_v12 = vld [vmem:[%s2342_s3 + $0x18] sm:$0xff]  ;;  %v380_v13 = vld [vmem:[%s2342_s3 + $0x20] sm:$0xff]  ;;  %v381_v15 = vld [vmem:[%s2342_s3 + $0x28] sm:$0xff]  ;;  %s2274_s17 = scalar_lea.hbm %s2344_s5, %s1654_s11  ;;  %s1743_s11 = scalar_lea.hbm %s2343_s4, 4 }
  0x25   : > { %593 = vmatpush.msra.mxu0 %v492_v38  ;;  %v526_v52 = vsub.f32 %v360_v34, %v511_v49  ;;  %v527_v53 = vsub.f32 %v361_v36, %v513_v51  ;;  %v524_v55 = vsub.f32 %v358_v43, %v507_v47  ;;  %649 = vmatpush.msra.mxu1 %v493_v48  ;;  %v382_v16 = vld [vmem:[%s2342_s3 + $0x30] sm:$0xff]  ;;  %v383_v17 = vld [vmem:[%s2342_s3 + $0x38] sm:$0xff]  ;;  %v384_v18 = vld [vmem:[%s2342_s3 + $0x40] sm:$0xff]  ;;  %s1366_s25 = sshll.u32 %s2274_s17, 4  ;;  %p1745_p2 = scmp.lt.s32.totalorder %s1743_s11, %s1739_s8  ;;  %s1367_s25 = int_to_ptr.hbm [resolvable:$true] %s1366_s25 }
  0x26   : > { %1525 = vmatmul.msk.f32.vlgmr.msra.gmra.mxu0 %vm532_vm2, %v376_v30  ;;  %v711_v57 = vrot.slane %v1979_v50, 5  ;;  %v509_v58 = vsel %vm475_vm1, %v505_v24, %v508_v41  ;;  %v713_v62 = vrot.slane %v1982_v54, 5  ;;  %1539 = vmatmul.msk.f32.vlgmr.msra.gmra.mxu1 %vm532_vm2, %v376_v30  ;;  %v385_v19 = vld [vmem:[%s2342_s3 + $0x48] sm:$0xff]  ;;  %v386_v20 = vld [vmem:[%s2342_s3 + $0x50] sm:$0xff]  ;;  %v387_v21 = vld [vmem:[%s2342_s3 + $0x58] sm:$0xff]  ;;  %v2088_v24 = vperm.slane %v1950_v14, 4 }
  0x27   : > { %v707_v60 = vrot.slane %v526_v52, 5  ;;  %v709_v61 = vrot.slane %v527_v53, 5  ;;  %v702_v0 = vrot.slane %v524_v55, 5  ;;  %v525_v1 = vsub.f32 %v359_v56, %v509_v58  ;;  %v388_v22 = vld [vmem:[%s2342_s3 + $0x60] sm:$0xf]  ;;  %p1746_p3 = por %p1745_p2, %p1744_p1 }
  0x28   : > { %v2095_v38 = vperm.slane %v1979_v50, 1  ;;  %v2098_v39 = vperm.slane %v1982_v54, 1 }
  0x29   : > { %v712_v2 = vsel %vm700_vm3, %v707_v60, %v711_v57  ;;  %v714_v3 = vsel %vm700_vm3, %v709_v61, %v713_v62  ;;  %v708_v4 = vsel %vm700_vm3, %v702_v0, %v707_v60  ;;  %v705_v5 = vrot.slane %v525_v1, 5  ;;  %p1747_p5 = pnand %p1746_p3, %p1742_p0 }
  0x2a   : > { %1552 = vmatpush.msk.msra.mxu2 %vm414_vm0, %v712_v2  ;;  %1566 = vmatpush.msk.msra.mxu3 %vm414_vm0, %v714_v3  ;;  %v703_v7 = vsel %vm700_vm3, %v701_v59, %v702_v0 }
  0x2b   : > { %v710_v8 = vsel %vm700_vm3, %v705_v5, %v709_v61  ;;  %v706_v10 = vsel %vm700_vm3, %v704_v63, %v705_v5 }
  0x2c   : > { %737 = vmatpush.msra.mxu2 %v708_v4  ;;  %793 = vmatpush.msra.mxu3 %v710_v8 }
  0x2e   : > { %1526 = vmatmul.msk.f32.gmra.mxu0 %vm532_vm2, %v377_v6  ;;  %738 = vmatpush.msra.mxu2 %v703_v7 }
  0x2f   : > { %794 = vmatpush.msra.mxu3 %v706_v10  ;;  %1553 = vmatmul.msk.f32.vlgmr.msra.gmra.mxu2 %vm532_vm2, %v376_v30 }
  0x30   : > { %1567 = vmatmul.msk.f32.vlgmr.msra.gmra.mxu3 %vm532_vm2, %v376_v30  ;;  %1540 = vmatmul.msk.f32.gmra.mxu1 %vm532_vm2, %v377_v6 }
  0x36   : > { %1527 = vmatmul.msk.f32.gmra.mxu0 %vm532_vm2, %v378_v11 }
  0x37   : > { %1554 = vmatmul.msk.f32.gmra.mxu2 %vm532_vm2, %v377_v6 }
  0x38   : > { %1568 = vmatmul.msk.f32.gmra.mxu3 %vm532_vm2, %v377_v6  ;;  %1541 = vmatmul.msk.f32.gmra.mxu1 %vm532_vm2, %v378_v11 }
  0x3e   : > { %1528 = vmatmul.msk.f32.gmra.mxu0 %vm532_vm2, %v379_v12 }
  0x3f   : > { %1555 = vmatmul.msk.f32.gmra.mxu2 %vm532_vm2, %v378_v11 }
  0x40   : > { %1569 = vmatmul.msk.f32.gmra.mxu3 %vm532_vm2, %v378_v11  ;;  %1542 = vmatmul.msk.f32.gmra.mxu1 %vm532_vm2, %v379_v12 }
  0x46   : > { %1529 = vmatmul.msk.f32.gmra.mxu0 %vm532_vm2, %v380_v13 }
  0x47   : > { %1556 = vmatmul.msk.f32.gmra.mxu2 %vm532_vm2, %v379_v12 }
  0x48   : > { %1570 = vmatmul.msk.f32.gmra.mxu3 %vm532_vm2, %v379_v12  ;;  %1543 = vmatmul.msk.f32.gmra.mxu1 %vm532_vm2, %v380_v13 }
  0x4e   : > { %1530 = vmatmul.msk.f32.gmra.mxu0 %vm532_vm2, %v381_v15 }
  0x4f   : > { %1557 = vmatmul.msk.f32.gmra.mxu2 %vm532_vm2, %v380_v13 }
  0x50   : > { %1571 = vmatmul.msk.f32.gmra.mxu3 %vm532_vm2, %v380_v13  ;;  %1544 = vmatmul.msk.f32.gmra.mxu1 %vm532_vm2, %v381_v15 }
  0x56   : > { %1531 = vmatmul.msk.f32.gmra.mxu0 %vm532_vm2, %v382_v16 }
  0x57   : > { %1558 = vmatmul.msk.f32.gmra.mxu2 %vm532_vm2, %v381_v15 }
  0x58   : > { %1572 = vmatmul.msk.f32.gmra.mxu3 %vm532_vm2, %v381_v15  ;;  %1545 = vmatmul.msk.f32.gmra.mxu1 %vm532_vm2, %v382_v16 }
  0x5e   : > { %1532 = vmatmul.msk.f32.gmra.mxu0 %vm532_vm2, %v383_v17 }
  0x5f   : > { %1559 = vmatmul.msk.f32.gmra.mxu2 %vm532_vm2, %v382_v16 }
  0x60   : > { %1573 = vmatmul.msk.f32.gmra.mxu3 %vm532_vm2, %v382_v16  ;;  %1546 = vmatmul.msk.f32.gmra.mxu1 %vm532_vm2, %v383_v17 }
  0x66   : > { %1533 = vmatmul.msk.f32.gmra.mxu0 %vm532_vm2, %v384_v18 }
  0x67   : > { %1560 = vmatmul.msk.f32.gmra.mxu2 %vm532_vm2, %v383_v17 }
  0x68   : > { %1574 = vmatmul.msk.f32.gmra.mxu3 %vm532_vm2, %v383_v17  ;;  %1547 = vmatmul.msk.f32.gmra.mxu1 %vm532_vm2, %v384_v18 }
  0x6e   : > { %1534 = vmatmul.msk.f32.gmra.mxu0 %vm532_vm2, %v385_v19 }
  0x6f   : > { %1561 = vmatmul.msk.f32.gmra.mxu2 %vm532_vm2, %v384_v18 }
  0x70   : > { %1575 = vmatmul.msk.f32.gmra.mxu3 %vm532_vm2, %v384_v18  ;;  %1548 = vmatmul.msk.f32.gmra.mxu1 %vm532_vm2, %v385_v19 }
  0x76   : > { %1535 = vmatmul.msk.f32.gmra.mxu0 %vm532_vm2, %v386_v20 }
  0x77   : > { %1562 = vmatmul.msk.f32.gmra.mxu2 %vm532_vm2, %v385_v19 }
  0x78   : > { %1576 = vmatmul.msk.f32.gmra.mxu3 %vm532_vm2, %v385_v19  ;;  %1549 = vmatmul.msk.f32.gmra.mxu1 %vm532_vm2, %v386_v20 }
  0x7e   : > { %1536 = vmatmul.msk.f32.gmra.mxu0 %vm532_vm2, %v387_v21 }
  0x7f   : > { %1563 = vmatmul.msk.f32.gmra.mxu2 %vm532_vm2, %v386_v20 }
  0x80   : > { %1577 = vmatmul.msk.f32.gmra.mxu3 %vm532_vm2, %v386_v20  ;;  %1550 = vmatmul.msk.f32.gmra.mxu1 %vm532_vm2, %v387_v21 }
  0x86   : > { %1537 = vmatmul.msk.f32.gmra.mxu0 %vm532_vm2, %v388_v22 }
  0x87   : > { %1564 = vmatmul.msk.f32.gmra.mxu2 %vm532_vm2, %v387_v21 }
  0x88   : > { %1578 = vmatmul.msk.f32.gmra.mxu3 %vm532_vm2, %v387_v21  ;;  %1551 = vmatmul.msk.f32.gmra.mxu1 %vm532_vm2, %v388_v22 }
  0x8f   : > { %1565 = vmatmul.msk.f32.gmra.mxu2 %vm532_vm2, %v388_v22 }
  0x90   : > { %1579 = vmatmul.msk.f32.gmra.mxu3 %vm532_vm2, %v388_v22 }
  0xa3   : > { %v595_v25 = vpop.f32.mrf.mxu0  ;;  %v651_v27 = vpop.f32.mrf.mxu1 }
  0xa4   : > { %v596_v26 = vadd.f32 %v595_v25, %v2085_v23  ;;  %v652_v29 = vadd.f32 %v651_v27, %v2088_v24 }
  0xa6   : > { %v835_v28 = vand.u32 2147483647, %v596_v26  ;;  %v836_v30 = vand.u32 2147483647, %v652_v29 }
  0xa8   : > { %v913_v31 = vmul.f32 0.5, %v835_v28  ;;  %v914_v34 = vmul.f32 0.5, %v836_v30  ;;  %v1580_v36 = vadd.f32 -0.5, %v835_v28  ;;  %vm887_vm4 = vcmp.lt.f32.partialorder %v835_v28, 1.0 }
  0xa9   : > { %v1581_v43 = vadd.f32 -0.5, %v836_v30  ;;  %vm888_vm6 = vcmp.lt.f32.partialorder %v836_v30, 1.0 }
  0xaa   : > { %v939_v35 = vmul.f32 %v913_v31, %v835_v28  ;;  %v940_v42 = vmul.f32 %v914_v34, %v836_v30 }
  0xab   : > { %v598_v32 = vpop.f32.mrf.mxu0 }
  0xac   : > { %v599_v33 = vadd.f32 %v598_v32, %v2085_v23  ;;  %v991_v45 = vsel %vm887_vm4, %v939_v35, %v1580_v36  ;;  %v992_v55 = vsel %vm888_vm6, %v940_v42, %v1581_v43 }
  0xad   : > { %v654_v37 = vpop.f32.mrf.mxu1 }
  0xae   : > { %v837_v9 = vand.u32 2147483647, %v599_v33  ;;  %v655_v14 = vadd.f32 %v654_v37, %v2088_v24 }
  0xb0   : > { %v915_v40 = vmul.f32 0.5, %v837_v9  ;;  %v1582_v41 = vadd.f32 -0.5, %v837_v9  ;;  %vm889_vm5 = vcmp.lt.f32.partialorder %v837_v9, 1.0  ;;  %v838_v44 = vand.u32 2147483647, %v655_v14 }
  0xb2   : > { %v941_v46 = vmul.f32 %v915_v40, %v837_v9  ;;  %v916_v47 = vmul.f32 0.5, %v838_v44  ;;  %v1583_v48 = vadd.f32 -0.5, %v838_v44  ;;  %v740_v49 = vpop.f32.mrf.mxu2  ;;  %vm890_vm7 = vcmp.lt.f32.partialorder %v838_v44, 1.0 }
  0xb3   : > { %v601_v51 = vpop.f32.mrf.mxu0  ;;  %v741_v50 = vadd.f32 %v740_v49, %v2095_v38  ;;  %v796_v53 = vpop.f32.mrf.mxu3 }
  0xb4   : > { %v993_v52 = vsel %vm889_vm5, %v941_v46, %v1582_v41  ;;  %v602_v54 = vadd.f32 %v601_v51, %v2085_v23  ;;  %v942_v57 = vmul.f32 %v916_v47, %v838_v44  ;;  %v797_v58 = vadd.f32 %v796_v53, %v2098_v39 }
  0xb5   : > { %v1147_v56 = vadd.f32 %v993_v52, %v991_v45  ;;  %v861_v59 = vand.u32 2147483647, %v741_v50  ;;  %v657_v61 = vpop.f32.mrf.mxu1 }
  0xb6   : > { %v839_v60 = vand.u32 2147483647, %v602_v54  ;;  %v994_v62 = vsel %vm890_vm7, %v942_v57, %v1583_v48  ;;  %v862_v63 = vand.u32 2147483647, %v797_v58  ;;  %v658_v0 = vadd.f32 %v657_v61, %v2088_v24 }
  0xb7   : > { %v1166_v1 = vadd.f32 %v994_v62, %v992_v55  ;;  %v1043_v2 = vmul.f32 0.5, %v861_v59  ;;  %vm1017_vm8 = vcmp.lt.f32.partialorder %v861_v59, 1.0  ;;  %v1606_v7 = vadd.f32 -0.5, %v861_v59 }
  0xb8   : > { %v1044_v3 = vmul.f32 0.5, %v862_v63  ;;  %v917_v4 = vmul.f32 0.5, %v839_v60  ;;  %v1584_v5 = vadd.f32 -0.5, %v839_v60  ;;  %v840_v6 = vand.u32 2147483647, %v658_v0 }
  0xb9   : > { %vm891_vm9 = vcmp.lt.f32.partialorder %v839_v60, 1.0  ;;  %v1069_v11 = vmul.f32 %v1043_v2, %v861_v59  ;;  %v1607_v20 = vadd.f32 -0.5, %v862_v63  ;;  %vm1018_vm11 = vcmp.lt.f32.partialorder %v862_v63, 1.0 }
  0xba   : > { %v743_v8 = vpop.f32.mrf.mxu2  ;;  %v1070_v12 = vmul.f32 %v1044_v3, %v862_v63  ;;  %v943_v13 = vmul.f32 %v917_v4, %v839_v60  ;;  %v918_v15 = vmul.f32 0.5, %v840_v6  ;;  %vm892_vm10 = vcmp.lt.f32.partialorder %v840_v6, 1.0 }
  0xbb   : > { %v604_v10 = vpop.f32.mrf.mxu0  ;;  %v799_v16 = vpop.f32.mrf.mxu3  ;;  %v1585_v17 = vadd.f32 -0.5, %v840_v6  ;;  %v744_v18 = vadd.f32 %v743_v8, %v2095_v38  ;;  %v1121_v31 = vsel %vm1017_vm8, %v1069_v11, %v1606_v7 }
  0xbc   : > { %v800_v19 = vadd.f32 %v799_v16, %v2098_v39  ;;  %v995_v21 = vsel %vm891_vm9, %v943_v13, %v1584_v5  ;;  %v944_v22 = vmul.f32 %v918_v15, %v840_v6  ;;  %v605_v25 = vadd.f32 %v604_v10, %v2085_v23 }
  0xbd   : > { %v660_v26 = vpop.f32.mrf.mxu1  ;;  %v1148_v27 = vadd.f32 %v1147_v56, %v995_v21  ;;  %v863_v28 = vand.u32 2147483647, %v744_v18  ;;  %v1122_v34 = vsel %vm1018_vm11, %v1070_v12, %v1607_v20 }
  0xbe   : > { %v864_v29 = vand.u32 2147483647, %v800_v19  ;;  %v661_v30 = vadd.f32 %v660_v26, %v2088_v24  ;;  %v996_v32 = vsel %vm892_vm10, %v944_v22, %v1585_v17  ;;  %v841_v33 = vand.u32 2147483647, %v605_v25 }
  0xbf   : > { %v1167_v35 = vadd.f32 %v1166_v1, %v996_v32  ;;  %v1045_v36 = vmul.f32 0.5, %v863_v28  ;;  %v1608_v9 = vadd.f32 -0.5, %v863_v28  ;;  %vm1019_vm12 = vcmp.lt.f32.partialorder %v863_v28, 1.0 }
  0xc0   : > { %vm1020_vm13 = vcmp.lt.f32.partialorder %v864_v29, 1.0  ;;  %v1046_v37 = vmul.f32 0.5, %v864_v29  ;;  %v1609_v14 = vadd.f32 -0.5, %v864_v29  ;;  %v919_v41 = vmul.f32 0.5, %v841_v33 }
  0xc1   : > { %v1071_v40 = vmul.f32 %v1045_v36, %v863_v28  ;;  %v1586_v42 = vadd.f32 -0.5, %v841_v33  ;;  %v842_v43 = vand.u32 2147483647, %v661_v30  ;;  %vm893_vm14 = vcmp.lt.f32.partialorder %v841_v33, 1.0 }
  0xc2   : > { %v746_v44 = vpop.f32.mrf.mxu2  ;;  %v1072_v46 = vmul.f32 %v1046_v37, %v864_v29  ;;  %v945_v52 = vmul.f32 %v919_v41, %v841_v33 }
  0xc3   : > { %v607_v45 = vpop.f32.mrf.mxu0  ;;  %v747_v47 = vadd.f32 %v746_v44, %v2095_v38  ;;  %v802_v48 = vpop.f32.mrf.mxu3  ;;  %v1123_v51 = vsel %vm1019_vm12, %v1071_v40, %v1608_v9  ;;  %vm894_vm15 = vcmp.lt.f32.partialorder %v842_v43, 1.0  ;;  %v920_v50 = vmul.f32 0.5, %v842_v43 }
  0xc4   : > { %v608_v49 = vadd.f32 %v607_v45, %v2085_v23  ;;  %v1187_v53 = vadd.f32 %v1123_v51, %v1121_v31  ;;  %v1124_v54 = vsel %vm1020_vm13, %v1072_v46, %v1609_v14  ;;  %v1587_v55 = vadd.f32 -0.5, %v842_v43 }
  0xc5   : > { %v865_v56 = vand.u32 2147483647, %v747_v47  ;;  %v663_v57 = vpop.f32.mrf.mxu1  ;;  %v1206_v58 = vadd.f32 %v1124_v54, %v1122_v34  ;;  %v997_v59 = vsel %vm893_vm14, %v945_v52, %v1586_v42  ;;  %v946_v60 = vmul.f32 %v920_v50, %v842_v43 }
  0xc6   : > { %v803_v61 = vadd.f32 %v802_v48, %v2098_v39  ;;  %v1149_v62 = vadd.f32 %v1148_v27, %v997_v59  ;;  %v843_v3 = vand.u32 2147483647, %v608_v49  ;;  %v664_v4 = vadd.f32 %v663_v57, %v2088_v24 }
  0xc7   : > { %vm1021_vm1 = vcmp.lt.f32.partialorder %v865_v56, 1.0  ;;  %v1047_v63 = vmul.f32 0.5, %v865_v56  ;;  %v1610_v0 = vadd.f32 -0.5, %v865_v56  ;;  %v998_v1 = vsel %vm894_vm15, %v946_v60, %v1587_v55 }
  0xc8   : > { %v866_v2 = vand.u32 2147483647, %v803_v61  ;;  %v1168_v5 = vadd.f32 %v1167_v35, %v998_v1  ;;  %vm895_vm3 = vcmp.lt.f32.partialorder %v843_v3, 1.0  ;;  %v921_v13 = vmul.f32 0.5, %v843_v3 }
  0xc9   : > { %v1073_v6 = vmul.f32 %v1047_v63, %v865_v56  ;;  %v1588_v15 = vadd.f32 -0.5, %v843_v3  ;;  %v844_v16 = vand.u32 2147483647, %v664_v4 }
  0xca   : > { %vm1022_vm2 = vcmp.lt.f32.partialorder %v866_v2, 1.0  ;;  %v1048_v7 = vmul.f32 0.5, %v866_v2  ;;  %v1611_v8 = vadd.f32 -0.5, %v866_v2  ;;  %v749_v10 = vpop.f32.mrf.mxu2  ;;  %v947_v22 = vmul.f32 %v921_v13, %v843_v3 }
  0xcb   : > { %v610_v11 = vpop.f32.mrf.mxu0  ;;  %v1125_v12 = vsel %vm1021_vm1, %v1073_v6, %v1610_v0  ;;  %v805_v17 = vpop.f32.mrf.mxu3  ;;  %v750_v20 = vadd.f32 %v749_v10, %v2095_v38  ;;  %vm896_vm4 = vcmp.lt.f32.partialorder %v844_v16, 1.0  ;;  %v922_v25 = vmul.f32 0.5, %v844_v16 }
  0xcc   : > { %v1188_v18 = vadd.f32 %v1187_v53, %v1125_v12  ;;  %v1074_v19 = vmul.f32 %v1048_v7, %v866_v2  ;;  %v806_v21 = vadd.f32 %v805_v17, %v2098_v39  ;;  %v1589_v26 = vadd.f32 -0.5, %v844_v16 }
  0xcd   : > { %v666_v27 = vpop.f32.mrf.mxu1  ;;  %v867_v29 = vand.u32 2147483647, %v750_v20  ;;  %v611_v31 = vadd.f32 %v610_v11, %v2085_v23  ;;  %v999_v33 = vsel %vm895_vm3, %v947_v22, %v1588_v15  ;;  %v948_v34 = vmul.f32 %v922_v25, %v844_v16 }
  0xce   : > { %v1126_v28 = vsel %vm1022_vm2, %v1074_v19, %v1611_v8  ;;  %v868_v30 = vand.u32 2147483647, %v806_v21  ;;  %v667_v35 = vadd.f32 %v666_v27, %v2088_v24  ;;  %v1150_v36 = vadd.f32 %v1149_v62, %v999_v33 }
  0xcf   : > { %v1207_v32 = vadd.f32 %v1206_v58, %v1126_v28  ;;  %v1049_v9 = vmul.f32 0.5, %v867_v29  ;;  %v1612_v37 = vadd.f32 -0.5, %v867_v29  ;;  %v1000_v14 = vsel %vm896_vm4, %v948_v34, %v1589_v26 }
  0xd0   : > { %vm1023_vm5 = vcmp.lt.f32.partialorder %v867_v29, 1.0  ;;  %vm1024_vm6 = vcmp.lt.f32.partialorder %v868_v30, 1.0  ;;  %v1050_v40 = vmul.f32 0.5, %v868_v30  ;;  %v1169_v41 = vadd.f32 %v1168_v5, %v1000_v14 }
  0xd1   : > { %v1075_v42 = vmul.f32 %v1049_v9, %v867_v29  ;;  %v845_v43 = vand.u32 2147483647, %v611_v31  ;;  %v846_v44 = vand.u32 2147483647, %v667_v35  ;;  %v1613_v48 = vadd.f32 -0.5, %v868_v30 }
  0xd2   : > { %v752_v45 = vpop.f32.mrf.mxu2  ;;  %v1076_v47 = vmul.f32 %v1050_v40, %v868_v30 }
  0xd3   : > { %v613_v46 = vpop.f32.mrf.mxu0  ;;  %v753_v49 = vadd.f32 %v752_v45, %v2095_v38  ;;  %v808_v51 = vpop.f32.mrf.mxu3  ;;  %v1127_v50 = vsel %vm1023_vm5, %v1075_v42, %v1612_v37  ;;  %vm897_vm7 = vcmp.lt.f32.partialorder %v845_v43, 1.0  ;;  %v923_v53 = vmul.f32 0.5, %v845_v43 }
  0xd4   : > { %v614_v52 = vadd.f32 %v613_v46, %v2085_v23  ;;  %v1590_v54 = vadd.f32 -0.5, %v845_v43  ;;  %v1189_v55 = vadd.f32 %v1188_v18, %v1127_v50  ;;  %v1128_v56 = vsel %vm1024_vm6, %v1076_v47, %v1613_v48 }
  0xd5   : > { %vm898_vm8 = vcmp.lt.f32.partialorder %v846_v44, 1.0  ;;  %v924_v57 = vmul.f32 0.5, %v846_v44  ;;  %v669_v58 = vpop.f32.mrf.mxu1  ;;  %v1208_v59 = vadd.f32 %v1207_v32, %v1128_v56  ;;  %v949_v60 = vmul.f32 %v923_v53, %v845_v43 }
  0xd6   : > { %v1591_v61 = vadd.f32 -0.5, %v846_v44  ;;  %v869_v62 = vand.u32 2147483647, %v753_v49  ;;  %v809_v0 = vadd.f32 %v808_v51, %v2098_v39  ;;  %v847_v1 = vand.u32 2147483647, %v614_v52 }
  0xd7   : > { %v950_v63 = vmul.f32 %v924_v57, %v846_v44  ;;  %v670_v2 = vadd.f32 %v669_v58, %v2088_v24  ;;  %v1001_v3 = vsel %vm897_vm7, %v949_v60, %v1590_v54 }
  0xd8   : > { %vm1025_vm9 = vcmp.lt.f32.partialorder %v869_v62, 1.0  ;;  %v1051_v4 = vmul.f32 0.5, %v869_v62  ;;  %v1614_v5 = vadd.f32 -0.5, %v869_v62  ;;  %v1151_v6 = vadd.f32 %v1150_v36, %v1001_v3 }
  0xd9   : > { %v1002_v7 = vsel %vm898_vm8, %v950_v63, %v1591_v61  ;;  %v870_v8 = vand.u32 2147483647, %v809_v0  ;;  %vm899_vm10 = vcmp.lt.f32.partialorder %v847_v1, 1.0  ;;  %v925_v12 = vmul.f32 0.5, %v847_v1 }
  0xda   : > { %v1170_v10 = vadd.f32 %v1169_v41, %v1002_v7  ;;  %v1077_v11 = vmul.f32 %v1051_v4, %v869_v62  ;;  %v1592_v13 = vadd.f32 -0.5, %v847_v1  ;;  %v755_v15 = vpop.f32.mrf.mxu2  ;;  %v848_v19 = vand.u32 2147483647, %v670_v2 }
  0xdb   : > { %v616_v16 = vpop.f32.mrf.mxu0  ;;  %vm1026_vm11 = vcmp.lt.f32.partialorder %v870_v8, 1.0  ;;  %v1052_v17 = vmul.f32 0.5, %v870_v8  ;;  %v1615_v18 = vadd.f32 -0.5, %v870_v8  ;;  %v811_v20 = vpop.f32.mrf.mxu3  ;;  %v951_v22 = vmul.f32 %v925_v12, %v847_v1 }
  0xdc   : > { %v1129_v21 = vsel %vm1025_vm9, %v1077_v11, %v1614_v5  ;;  %v756_v25 = vadd.f32 %v755_v15, %v2095_v38  ;;  %v812_v26 = vadd.f32 %v811_v20, %v2098_v39  ;;  %vm900_vm12 = vcmp.lt.f32.partialorder %v848_v19, 1.0 }
  0xdd   : > { %v1190_v27 = vadd.f32 %v1189_v55, %v1129_v21  ;;  %v1078_v28 = vmul.f32 %v1052_v17, %v870_v8  ;;  %v926_v29 = vmul.f32 0.5, %v848_v19  ;;  %v672_v30 = vpop.f32.mrf.mxu1  ;;  %v1003_v31 = vsel %vm899_vm10, %v951_v22, %v1592_v13 }
  0xde   : > { %v1593_v32 = vadd.f32 -0.5, %v848_v19  ;;  %v871_v33 = vand.u32 2147483647, %v756_v25  ;;  %v872_v34 = vand.u32 2147483647, %v812_v26  ;;  %v1152_v36 = vadd.f32 %v1151_v6, %v1003_v31 }
  0xdf   : > { %v1130_v35 = vsel %vm1026_vm11, %v1078_v28, %v1615_v18  ;;  %v952_v9 = vmul.f32 %v926_v29, %v848_v19  ;;  %v617_v37 = vadd.f32 %v616_v16, %v2085_v23  ;;  %v673_v47 = vadd.f32 %v672_v30, %v2088_v24 }
  0xe0   : > { %v1209_v14 = vadd.f32 %v1208_v59, %v1130_v35  ;;  %v1053_v40 = vmul.f32 0.5, %v871_v33  ;;  %v1616_v41 = vadd.f32 -0.5, %v871_v33  ;;  %vm1027_vm13 = vcmp.lt.f32.partialorder %v871_v33, 1.0 }
  0xe1   : > { %v1004_v42 = vsel %vm900_vm12, %v952_v9, %v1593_v32  ;;  %vm1028_vm14 = vcmp.lt.f32.partialorder %v872_v34, 1.0  ;;  %v1054_v43 = vmul.f32 0.5, %v872_v34  ;;  %v849_v46 = vand.u32 2147483647, %v617_v37 }
  0xe2   : > { %v1171_v44 = vadd.f32 %v1170_v10, %v1004_v42  ;;  %v1079_v45 = vmul.f32 %v1053_v40, %v871_v33  ;;  %v758_v48 = vpop.f32.mrf.mxu2  ;;  %v1617_v52 = vadd.f32 -0.5, %v872_v34  ;;  %v850_v60 = vand.u32 2147483647, %v673_v47 }
  0xe3   : > { %v619_v49 = vpop.f32.mrf.mxu0  ;;  %v1080_v51 = vmul.f32 %v1054_v43, %v872_v34  ;;  %v759_v50 = vadd.f32 %v758_v48, %v2095_v38  ;;  %v814_v53 = vpop.f32.mrf.mxu3  ;;  %vm901_vm15 = vcmp.lt.f32.partialorder %v849_v46, 1.0  ;;  %v927_v56 = vmul.f32 0.5, %v849_v46 }
  0xe4   : > { %v620_v54 = vadd.f32 %v619_v49, %v2085_v23  ;;  %v1131_v55 = vsel %vm1027_vm13, %v1079_v45, %v1616_v41  ;;  %v1594_v57 = vadd.f32 -0.5, %v849_v46  ;;  %v815_v1 = vadd.f32 %v814_v53, %v2098_v39 }
  0xe5   : > { %v1191_v58 = vadd.f32 %v1190_v27, %v1131_v55  ;;  %v1132_v59 = vsel %vm1028_vm14, %v1080_v51, %v1617_v52  ;;  %v873_v61 = vand.u32 2147483647, %v759_v50  ;;  %v675_v62 = vpop.f32.mrf.mxu1  ;;  %v953_v0 = vmul.f32 %v927_v56, %v849_v46 }
  0xe6   : > { %v1210_v63 = vadd.f32 %v1209_v14, %v1132_v59  ;;  %v851_v2 = vand.u32 2147483647, %v620_v54  ;;  %vm902_vm1 = vcmp.lt.f32.partialorder %v850_v60, 1.0  ;;  %v928_v3 = vmul.f32 0.5, %v850_v60  ;;  %v2151_v14 = vld [vmem:[%s314_s7] sm:$0xff]  ;;  %s1364_s7 = sshll.u32 %s2175_s27, 4  ;;  %s1365_s7 = int_to_ptr.vmem [resolvable:$true] %s1364_s7 }
  0xe7   : > { %v1595_v4 = vadd.f32 -0.5, %v850_v60  ;;  %vm1029_vm2 = vcmp.lt.f32.partialorder %v873_v61, 1.0  ;;  %v1005_v5 = vsel %vm901_vm15, %v953_v0, %v1594_v57  ;;  %v1055_v6 = vmul.f32 0.5, %v873_v61 }
  0xe8   : > { %v1618_v7 = vadd.f32 -0.5, %v873_v61  ;;  %v874_v8 = vand.u32 2147483647, %v815_v1  ;;  %v1153_v10 = vadd.f32 %v1152_v36, %v1005_v5  ;;  %v954_v11 = vmul.f32 %v928_v3, %v850_v60 }
  0xe9   : > { %vm903_vm3 = vcmp.lt.f32.partialorder %v851_v2, 1.0  ;;  %v929_v12 = vmul.f32 0.5, %v851_v2  ;;  %v1081_v13 = vmul.f32 %v1055_v6, %v873_v61  ;;  %v1596_v21 = vadd.f32 -0.5, %v851_v2 }
  0xea   : > { %vm1030_vm4 = vcmp.lt.f32.partialorder %v874_v8, 1.0  ;;  %v1056_v15 = vmul.f32 0.5, %v874_v8  ;;  %v1619_v16 = vadd.f32 -0.5, %v874_v8  ;;  %v761_v17 = vpop.f32.mrf.mxu2  ;;  %v1006_v19 = vsel %vm902_vm1, %v954_v11, %v1595_v4 }
  0xeb   : > { %v622_v18 = vpop.f32.mrf.mxu0  ;;  %v955_v20 = vmul.f32 %v929_v12, %v851_v2  ;;  %v676_v22 = vadd.f32 %v675_v62, %v2088_v24  ;;  %v817_v25 = vpop.f32.mrf.mxu3  ;;  %v1172_v26 = vadd.f32 %v1171_v44, %v1006_v19  ;;  %v1133_v27 = vsel %vm1029_vm2, %v1081_v13, %v1618_v7 }
  0xec   : > { %v1082_v28 = vmul.f32 %v1056_v15, %v874_v8  ;;  %v762_v29 = vadd.f32 %v761_v17, %v2095_v38  ;;  %v1192_v30 = vadd.f32 %v1191_v58, %v1133_v27  ;;  %v818_v33 = vadd.f32 %v817_v25, %v2098_v39 }
  0xed   : > { %v1007_v31 = vsel %vm903_vm3, %v955_v20, %v1596_v21  ;;  %v852_v32 = vand.u32 2147483647, %v676_v22  ;;  %v678_v34 = vpop.f32.mrf.mxu1  ;;  %v623_v37 = vadd.f32 %v622_v18, %v2085_v23  ;;  %v396_v49 = vrot.slane %v2151_v14, 5 }
  0xee   : > { %v1134_v35 = vsel %vm1030_vm4, %v1082_v28, %v1619_v16  ;;  %v1154_v36 = vadd.f32 %v1153_v10, %v1007_v31  ;;  %v875_v9 = vand.u32 2147483647, %v762_v29  ;;  %v876_v45 = vand.u32 2147483647, %v818_v33 }
  0xef   : > { %v1211_v40 = vadd.f32 %v1210_v63, %v1134_v35  ;;  %vm904_vm5 = vcmp.lt.f32.partialorder %v852_v32, 1.0  ;;  %v930_v41 = vmul.f32 0.5, %v852_v32  ;;  %v1597_v42 = vadd.f32 -0.5, %v852_v32 }
  0xf0   : > { %vm1031_vm6 = vcmp.lt.f32.partialorder %v875_v9, 1.0  ;;  %v1057_v43 = vmul.f32 0.5, %v875_v9  ;;  %v1620_v44 = vadd.f32 -0.5, %v875_v9  ;;  %v853_v47 = vand.u32 2147483647, %v623_v37 }
  0xf1   : > { %v956_v46 = vmul.f32 %v930_v41, %v852_v32  ;;  %v679_v48 = vadd.f32 %v678_v34, %v2088_v24  ;;  %vm1032_vm7 = vcmp.lt.f32.partialorder %v876_v45, 1.0  ;;  %v1058_v52 = vmul.f32 0.5, %v876_v45 }
  0xf2   : > { %v1083_v51 = vmul.f32 %v1057_v43, %v875_v9  ;;  %v1621_v50 = vadd.f32 -0.5, %v876_v45  ;;  %v764_v53 = vpop.f32.mrf.mxu2  ;;  %vm905_vm8 = vcmp.lt.f32.partialorder %v853_v47, 1.0  ;;  %v931_v56 = vmul.f32 0.5, %v853_v47 }
  0xf3   : > { %v625_v54 = vpop.f32.mrf.mxu0  ;;  %v1008_v55 = vsel %vm904_vm5, %v956_v46, %v1597_v42  ;;  %v1598_v57 = vadd.f32 -0.5, %v853_v47  ;;  %v820_v58 = vpop.f32.mrf.mxu3  ;;  %v1084_v61 = vmul.f32 %v1058_v52, %v876_v45  ;;  %v854_v62 = vand.u32 2147483647, %v679_v48 }
  0xf4   : > { %v1173_v59 = vadd.f32 %v1172_v26, %v1008_v55  ;;  %v1135_v60 = vsel %vm1031_vm6, %v1083_v51, %v1620_v44  ;;  %v957_v0 = vmul.f32 %v931_v56, %v853_v47  ;;  %v765_v1 = vadd.f32 %v764_v53, %v2095_v38 }
  0xf5   : > { %v1193_v63 = vadd.f32 %v1192_v30, %v1135_v60  ;;  %v821_v2 = vadd.f32 %v820_v58, %v2098_v39  ;;  %v681_v3 = vpop.f32.mrf.mxu1  ;;  %v1136_v4 = vsel %vm1032_vm7, %v1084_v61, %v1621_v50  ;;  %vm906_vm9 = vcmp.lt.f32.partialorder %v854_v62, 1.0 }
  0xf6   : > { %v932_v5 = vmul.f32 0.5, %v854_v62  ;;  %v1599_v6 = vadd.f32 -0.5, %v854_v62  ;;  %v1212_v7 = vadd.f32 %v1211_v40, %v1136_v4  ;;  %v1009_v8 = vsel %vm905_vm8, %v957_v0, %v1598_v57 }
  0xf7   : > { %v877_v10 = vand.u32 2147483647, %v765_v1  ;;  %v878_v11 = vand.u32 2147483647, %v821_v2  ;;  %v1155_v12 = vadd.f32 %v1154_v36, %v1009_v8  ;;  %v626_v15 = vadd.f32 %v625_v54, %v2085_v23 }
  0xf8   : > { %v958_v13 = vmul.f32 %v932_v5, %v854_v62  ;;  %v682_v16 = vadd.f32 %v681_v3, %v2088_v24 }
  0xf9   : > { %vm1033_vm10 = vcmp.lt.f32.partialorder %v877_v10, 1.0  ;;  %v1059_v17 = vmul.f32 0.5, %v877_v10  ;;  %v1622_v18 = vadd.f32 -0.5, %v877_v10  ;;  %vm1034_vm11 = vcmp.lt.f32.partialorder %v878_v11, 1.0 }
  0xfa   : > { %v1010_v19 = vsel %vm906_vm9, %v958_v13, %v1599_v6  ;;  %v1060_v20 = vmul.f32 0.5, %v878_v11  ;;  %v1623_v21 = vadd.f32 -0.5, %v878_v11  ;;  %v855_v22 = vand.u32 2147483647, %v626_v15  ;;  %v767_v25 = vpop.f32.mrf.mxu2 }
  0xfb   : > { %v628_v26 = vpop.f32.mrf.mxu0  ;;  %v1174_v27 = vadd.f32 %v1173_v59, %v1010_v19  ;;  %v1085_v28 = vmul.f32 %v1059_v17, %v877_v10  ;;  %v856_v29 = vand.u32 2147483647, %v682_v16  ;;  %v768_v30 = vadd.f32 %v767_v25, %v2095_v38  ;;  %v823_v31 = vpop.f32.mrf.mxu3 }
  0xfc   : > { %v1086_v32 = vmul.f32 %v1060_v20, %v878_v11  ;;  %vm907_vm12 = vcmp.lt.f32.partialorder %v855_v22, 1.0  ;;  %v933_v33 = vmul.f32 0.5, %v855_v22  ;;  %v1600_v34 = vadd.f32 -0.5, %v855_v22 }
  0xfd   : > { %v1137_v35 = vsel %vm1033_vm10, %v1085_v28, %v1622_v18  ;;  %vm908_vm13 = vcmp.lt.f32.partialorder %v856_v29, 1.0  ;;  %v934_v36 = vmul.f32 0.5, %v856_v29  ;;  %v1601_v9 = vadd.f32 -0.5, %v856_v29  ;;  %v684_v37 = vpop.f32.mrf.mxu1 }
  0xfe   : > { %v1194_v40 = vadd.f32 %v1193_v63, %v1137_v35  ;;  %v1138_v41 = vsel %vm1034_vm11, %v1086_v32, %v1623_v21  ;;  %v959_v42 = vmul.f32 %v933_v33, %v855_v22  ;;  %v879_v43 = vand.u32 2147483647, %v768_v30 }
  0xff   : > { %v1213_v44 = vadd.f32 %v1212_v7, %v1138_v41  ;;  %v960_v45 = vmul.f32 %v934_v36, %v856_v29  ;;  %v824_v46 = vadd.f32 %v823_v31, %v2098_v39  ;;  %v629_v47 = vadd.f32 %v628_v26, %v2085_v23 }
 0x100   : > { %v1011_v48 = vsel %vm907_vm12, %v959_v42, %v1600_v34  ;;  %vm1035_vm14 = vcmp.lt.f32.partialorder %v879_v43, 1.0  ;;  %v1061_v51 = vmul.f32 0.5, %v879_v43  ;;  %v1624_v52 = vadd.f32 -0.5, %v879_v43 }
 0x101   : > { %v1156_v50 = vadd.f32 %v1155_v12, %v1011_v48  ;;  %v1012_v53 = vsel %vm908_vm13, %v960_v45, %v1601_v9  ;;  %v880_v54 = vand.u32 2147483647, %v824_v46  ;;  %v857_v55 = vand.u32 2147483647, %v629_v47 }
 0x102   : > { %v1175_v56 = vadd.f32 %v1174_v27, %v1012_v53  ;;  %v1087_v57 = vmul.f32 %v1061_v51, %v879_v43  ;;  %v685_v58 = vadd.f32 %v684_v37, %v2088_v24  ;;  %v770_v59 = vpop.f32.mrf.mxu2  ;;  %v1835_v63 = vmov 0.0  }
 0x103   : > { %vm1036_vm15 = vcmp.lt.f32.partialorder %v880_v54, 1.0  ;;  %v1062_v60 = vmul.f32 0.5, %v880_v54  ;;  %v1625_v61 = vadd.f32 -0.5, %v880_v54  ;;  %vm909_vm1 = vcmp.lt.f32.partialorder %v857_v55, 1.0  ;;  %v826_v62 = vpop.f32.mrf.mxu3  ;;  %340 = vst [vmem:[%s2175_s27] sm:$0xff] %v1835_v63  ;;  %v631_v4 = vpop.f32.mrf.mxu0 }
 0x104   : > { %v1139_v0 = vsel %vm1035_vm14, %v1087_v57, %v1624_v52  ;;  %v935_v1 = vmul.f32 0.5, %v857_v55  ;;  %v1602_v2 = vadd.f32 -0.5, %v857_v55  ;;  %v858_v3 = vand.u32 2147483647, %v685_v58  ;;  %341 = vst [vmem:[%s2175_s27 + $0x8] sm:$0xff] %v1835_v63  ;;  %v2195_v52 = vld [vmem:[%s1934_s14 + $0x8] sm:$0xff] }
 0x105   : > { %v1195_v5 = vadd.f32 %v1194_v40, %v1139_v0  ;;  %v1088_v6 = vmul.f32 %v1062_v60, %v880_v54  ;;  %v771_v7 = vadd.f32 %v770_v59, %v2095_v38  ;;  %v827_v8 = vadd.f32 %v826_v62, %v2098_v39  ;;  %v687_v10 = vpop.f32.mrf.mxu1 }
 0x106   : > { %v961_v11 = vmul.f32 %v935_v1, %v857_v55  ;;  %vm910_vm2 = vcmp.lt.f32.partialorder %v858_v3, 1.0  ;;  %v936_v12 = vmul.f32 0.5, %v858_v3  ;;  %v1603_v13 = vadd.f32 -0.5, %v858_v3 }
 0x107   : > { %v1140_v15 = vsel %vm1036_vm15, %v1088_v6, %v1625_v61  ;;  %v881_v16 = vand.u32 2147483647, %v771_v7  ;;  %v882_v17 = vand.u32 2147483647, %v827_v8  ;;  %v632_v18 = vadd.f32 %v631_v4, %v2085_v23 }
 0x108   : > { %v1214_v19 = vadd.f32 %v1213_v44, %v1140_v15  ;;  %v1013_v20 = vsel %vm909_vm1, %v961_v11, %v1602_v2  ;;  %v962_v21 = vmul.f32 %v936_v12, %v858_v3  ;;  %v688_v22 = vadd.f32 %v687_v10, %v2088_v24 }
 0x109   : > { %v1157_v25 = vadd.f32 %v1156_v50, %v1013_v20  ;;  %vm1037_vm3 = vcmp.lt.f32.partialorder %v881_v16, 1.0  ;;  %v1063_v26 = vmul.f32 0.5, %v881_v16  ;;  %v1626_v27 = vadd.f32 -0.5, %v881_v16 }
 0x10a   : > { %v1014_v28 = vsel %vm910_vm2, %v962_v21, %v1603_v13  ;;  %vm1038_vm4 = vcmp.lt.f32.partialorder %v882_v17, 1.0  ;;  %v1064_v29 = vmul.f32 0.5, %v882_v17  ;;  %v1627_v30 = vadd.f32 -0.5, %v882_v17  ;;  %v773_v31 = vpop.f32.mrf.mxu2 }
 0x10b   : > { %v1176_v32 = vadd.f32 %v1175_v56, %v1014_v28  ;;  %v1089_v33 = vmul.f32 %v1063_v26, %v881_v16  ;;  %v859_v34 = vand.u32 2147483647, %v632_v18  ;;  %v860_v35 = vand.u32 2147483647, %v688_v22  ;;  %v829_v23 = vpop.f32.mrf.mxu3 }
 0x10c   : > { %v1090_v36 = vmul.f32 %v1064_v29, %v882_v17  ;;  %v774_v9 = vadd.f32 %v773_v31, %v2095_v38  ;;  %v830_v24 = vadd.f32 %v829_v23, %v2098_v39  ;;  %v2190_v37 = vrot.slane %v396_v49, 4 }
 0x10d   : > { %v1141_v40 = vsel %vm1037_vm3, %v1089_v33, %v1626_v27  ;;  %vm911_vm5 = vcmp.lt.f32.partialorder %v859_v34, 1.0  ;;  %v937_v41 = vmul.f32 0.5, %v859_v34  ;;  %v1604_v42 = vadd.f32 -0.5, %v859_v34 }
 0x10e   : > { %v1196_v43 = vadd.f32 %v1195_v5, %v1141_v40  ;;  %v1142_v44 = vsel %vm1038_vm4, %v1090_v36, %v1627_v30  ;;  %vm912_vm6 = vcmp.lt.f32.partialorder %v860_v35, 1.0  ;;  %v938_v45 = vmul.f32 0.5, %v860_v35 }
 0x10f   : > { %v1215_v46 = vadd.f32 %v1214_v19, %v1142_v44  ;;  %v963_v47 = vmul.f32 %v937_v41, %v859_v34  ;;  %v1605_v48 = vadd.f32 -0.5, %v860_v35  ;;  %v883_v51 = vand.u32 2147483647, %v774_v9 }
 0x110   : > { %v420_v50 = vrot.slane %v2195_v52, 4  ;;  %v964_v49 = vmul.f32 %v938_v45, %v860_v35  ;;  %v884_v53 = vand.u32 2147483647, %v830_v24  ;;  %v400_v57 = vsub.f32 %v2151_v14, %v2190_v37 }
 0x111   : > { %v1015_v54 = vsel %vm911_vm5, %v963_v47, %v1604_v42  ;;  %v1065_v55 = vmul.f32 0.5, %v883_v51  ;;  %v1628_v56 = vadd.f32 -0.5, %v883_v51  ;;  %vm1039_vm7 = vcmp.lt.f32.partialorder %v883_v51, 1.0 }
 0x112   : > { %v1158_v58 = vsel %vm414_vm0, %v1015_v54, 0.0  ;;  %v1016_v59 = vsel %vm912_vm6, %v964_v49, %v1605_v48  ;;  %v1066_v60 = vmul.f32 0.5, %v884_v53  ;;  %v776_v61 = vpop.f32.mrf.mxu2  ;;  %v1629_v1 = vadd.f32 -0.5, %v884_v53 }
 0x113   : > { %v1159_v62 = vadd.f32 %v1158_v58, %v1157_v25  ;;  %v1177_v63 = vsel %vm414_vm0, %v1016_v59, 0.0  ;;  %v1091_v0 = vmul.f32 %v1065_v55, %v883_v51  ;;  %v832_v2 = vpop.f32.mrf.mxu3  ;;  %v777_v5 = vadd.f32 %v776_v61, %v2095_v38  ;;  %v1722_v25 = vld [vmem:[%s1934_s14] sm:$0xff]  ;;  %s1516_s14 = sshll.u32 %s2164_s24, 1 }
 0x114   : > { %v1178_v3 = vadd.f32 %v1177_v63, %v1176_v32  ;;  %v1092_v4 = vmul.f32 %v1066_v60, %v884_v53  ;;  %v833_v6 = vadd.f32 %v832_v2, %v2098_v39  ;;  %vm1040_vm8 = vcmp.lt.f32.partialorder %v884_v53, 1.0  ;;  %s298_s12 = scalar_lea.vmem [#allocation2], %s1516_s14  ;;  %s1330_s14 = scalar_lea.sflag [#allocation3], %s2164_s24 }
 0x115   : > { %v1160_v7 = vrot.slane %v1159_v62, 4  ;;  %v1143_v8 = vsel %vm1039_vm7, %v1091_v0, %v1628_v56  ;;  %v401_v10 = vand.u32 2147483647, %v400_v57  ;;  %v885_v15 = vand.u32 2147483647, %v777_v5  ;;  %s1349_s13 = sshll.u32 %s298_s12, 4  ;;  %s1350_s13 = int_to_ptr.vmem [resolvable:$true] %s1349_s13 }
 0x116   : > { %v1179_v11 = vrot.slane %v1178_v3, 4  ;;  %v1197_v12 = vadd.f32 %v1196_v43, %v1143_v8  ;;  %v1144_v13 = vsel %vm1040_vm8, %v1092_v4, %v1629_v1  ;;  %v886_v18 = vand.u32 2147483647, %v833_v6  ;;  %v1250_v8 = vld [vmem:[%s2175_s27] ss:$8 sm:$0x3] }
 0x117   : > { %v1161_v16 = vadd.f32 %v1160_v7, %v1159_v62  ;;  %v1216_v17 = vadd.f32 %v1215_v46, %v1144_v13  ;;  %v402_v19 = vsub.f32 0.0, %v401_v10  ;;  %v1067_v21 = vmul.f32 0.5, %v885_v15  ;;  %v1632_v13 = vld [vmem:[%s2175_s27 + $0x1] ss:$8 sm:$0x3] }
 0x118   : > { %v1180_v20 = vadd.f32 %v1179_v11, %v1178_v3  ;;  %v1630_v22 = vadd.f32 -0.5, %v885_v15  ;;  %v409_v38 = vsub.f32 1.0, %v1722_v25  ;;  %vm1041_vm9 = vcmp.lt.f32.partialorder %v885_v15, 1.0 }
 0x119   : > { %v1162_v26 = vrot.slane %v1161_v16, 2  ;;  %vm1042_vm10 = vcmp.lt.f32.partialorder %v886_v18, 1.0  ;;  %v1068_v39 = vmul.f32 0.5, %v886_v18  ;;  %v1093_v28 = vmul.f32 %v1067_v21, %v885_v15 }
 0x11a   : > { %v1181_v27 = vrot.slane %v1180_v20, 2  ;;  %v403_v29 = vmul.f32 1.442695, %v402_v19  ;;  %v410_v30 = vsub.f32 1.0, %v2195_v52  ;;  %v1631_v33 = vadd.f32 -0.5, %v886_v18 }
 0x11b   : > { %v1163_v31 = vadd.f32 %v1162_v26, %v1161_v16  ;;  %v1094_v32 = vmul.f32 %v1068_v39, %v886_v18  ;;  %v421_v34 = vsel %vm414_vm0, %v1722_v25, %v420_v50  ;;  %v1145_v23 = vsel %vm1041_vm9, %v1093_v28, %v1630_v22  ;;  %v1640_v18 = vld [vmem:[%s2175_s27 + $0x5] ss:$8 sm:$0x3]  ;;  %v1642_v39 = vld [vmem:[%s2175_s27 + $0x6] ss:$8 sm:$0x3] }
 0x11c   : > { %v1182_v35 = vadd.f32 %v1181_v27, %v1180_v20  ;;  %1717 = vpow2.f32 %v403_v29  ;;  %v413_v36 = vrot.slane %v410_v30, 4  ;;  %v1198_v24 = vsel %vm414_vm0, %v1145_v23, 0.0 }
 0x11d   : > { %v1164_v9 = vrot.slane %v1163_v31, 1  ;;  %v1146_v40 = vsel %vm1042_vm10, %v1094_v32, %v1631_v33  ;;  %v422_v41 = vrot.slane %v421_v34, 7  ;;  %v1199_v43 = vadd.f32 %v1198_v24, %v1197_v12 }
 0x11e   : > { %v1183_v42 = vrot.slane %v1182_v35, 1  ;;  %v1217_v44 = vsel %vm414_vm0, %v1146_v40, 0.0  ;;  %v415_v45 = vsel %vm414_vm0, %v409_v38, %v413_v36  ;;  %v441_v50 = vrot.slane %v421_v34, 6 }
 0x11f   : > { %v1218_v46 = vadd.f32 %v1217_v44, %v1216_v17  ;;  %v424_v47 = vmul.f32 %v422_v41, %v2151_v14  ;;  %v1200_v48 = vrot.slane %v1199_v43, 4  ;;  %v438_v51 = vrot.slane %v415_v45, 7 }
 0x120   : > { %v457_v49 = vrot.slane %v1722_v25, 2  ;;  %v1165_v53 = vadd.f32 %v1164_v9, %v1163_v31  ;;  %v399_v55 = vmax.f32 %v2151_v14, %v2190_v37  ;;  %v458_v56 = vrot.slane %v2195_v52, 2 }
 0x121   : > { %v1219_v54 = vrot.slane %v1218_v46, 4  ;;  %v1184_v58 = vadd.f32 %v1183_v42, %v1182_v35  ;;  %v1201_v59 = vadd.f32 %v1200_v48, %v1199_v43  ;;  %v417_v60 = vmul.f32 %v415_v45, %v2151_v14 }
 0x122   : > { %v1718_v57 = vpop.eup %1717  ;;  %v443_v61 = vmul.f32 %v441_v50, %v2151_v14  ;;  %v1522_v0 = vrot.slane %v424_v47, 9  ;;  %v2218_v1 = vmul.f32 %v2195_v52, %v458_v56  ;;  %v440_v37 = vmul.f32 %v438_v51, %v2151_v14 }
 0x123   : > { %v1220_v62 = vadd.f32 %v1219_v54, %v1218_v46  ;;  %v405_v63 = vadd.f32 1.0, %v1718_v57  ;;  %v1202_v2 = vrot.slane %v1201_v59, 2  ;;  %v2221_v3 = vmul.f32 %v1722_v25, %v457_v49  ;;  %v1644_v46 = vld [vmem:[%s2175_s27 + $0x7] ss:$8 sm:$0x3] }
 0x124   : > { %v464_v4 = vmul.f32 %v458_v56, %v410_v30  ;;  %v1523_v6 = vrot.slane %v443_v61, 9  ;;  %v463_v7 = vmul.f32 %v457_v49, %v409_v38  ;;  %v466_v12 = vsub.f32 1.0, %v2218_v1 }
 0x125   : > { %v1221_v5 = vrot.slane %v1220_v62, 2  ;;  %1719 = vlog2.f32 %v405_v63  ;;  %v1203_v10 = vadd.f32 %v1202_v2, %v1201_v59  ;;  %v465_v11 = vsub.f32 1.0, %v2221_v3  ;;  %v1636_v2 = vld [vmem:[%s2175_s27 + $0x3] ss:$8 sm:$0x3] }
 0x126   : > { %v1236_v52 = vmul.f32 %v1184_v58, %v2218_v1  ;;  %v1245_v14 = vlaneseq  ;;  %v1253_v16 = vrot.slane %v2218_v1, 7  ;;  %v1263_v17 = vrot.slane %v464_v4, 7 }
 0x127   : > { %v1222_v15 = vadd.f32 %v1221_v5, %v1220_v62  ;;  %v1204_v19 = vrot.slane %v1203_v10, 1  ;;  %vm1242_vm0 = vcmask 1040384   ;;  %v1303_v20 = vrot.slane %v466_v12, 7  ;;  %v1634_v62 = vld [vmem:[%s2175_s27 + $0x2] ss:$8 sm:$0x3] }
 0x128   : > { %v1313_v21 = vrot.slane %v1236_v52, 7  ;;  %v1235_v25 = vmul.f32 %v1165_v53, %v2221_v3  ;;  %v1254_v38 = vsel %vm1242_vm0, %v2221_v3, %v1253_v16  ;;  %v1264_v26 = vsel %vm1242_vm0, %v463_v7, %v1263_v17 }
 0x129   : > { %v1223_v22 = vrot.slane %v1222_v15, 1  ;;  %vm2235_vm11 = vcmp.lt.s32.totalorder %v1245_v14, 256  ;;  %v1256_v28 = vadd.f32 %v1254_v38, %v1250_v8  ;;  %v1266_v29 = vadd.f32 %v1632_v13, %v1264_v26 }
 0x12a   : > { %v1304_v30 = vsel %vm1242_vm0, %v465_v11, %v1303_v20  ;;  %v1205_v32 = vadd.f32 %v1204_v19, %v1203_v10  ;;  %v1314_v35 = vsel %vm1242_vm0, %v1235_v25, %v1313_v21  ;;  %v429_v36 = vadd.f32 %v1522_v0, %v417_v60 }
 0x12b   : > { %v1720_v31 = vpop.eup %1719  ;;  %v1224_v33 = vadd.f32 %v1223_v22, %v1222_v15  ;;  %v1306_v34 = vadd.f32 %v1640_v18, %v1304_v30  ;;  %v448_v9 = vadd.f32 %v1523_v6, %v440_v37  ;;  %1633 = vst.msk [vmem:[%s2175_s27 + $0x1] ss:$8 sm:$0x3] %vm2235_vm11, %v1266_v29  ;;  %v1316_v24 = vadd.f32 %v1642_v39, %v1314_v35 }
 0x12c   : > { %v407_v23 = vmul.f32 0.6931472, %v1720_v31  ;;  %1257 = vst.msk [vmem:[%s2175_s27] ss:$8 sm:$0x3] %vm2235_vm11, %v1256_v28  ;;  %v1237_v42 = vmul.f32 %v1205_v32, %v2221_v3 }
 0x12d   : > { %v1238_v40 = vmul.f32 %v1224_v33, %v2218_v1  ;;  %1641 = vst.msk [vmem:[%s2175_s27 + $0x5] ss:$8 sm:$0x3] %vm2235_vm11, %v1306_v34 }
 0x12e   : > { %v408_v41 = vadd.f32 %v407_v23, %v399_v55  ;;  %1643 = vst.msk [vmem:[%s2175_s27 + $0x6] ss:$8 sm:$0x3] %vm2235_vm11, %v1316_v24 }
 0x12f   : > { %v1323_v43 = vrot.slane %v1238_v40, 7 }
 0x130   : > { %v430_v44 = vsub.f32 %v408_v41, %v429_v36  ;;  %v449_v45 = vsub.f32 %v408_v41, %v448_v9 }
 0x131   : > { %v1324_v47 = vsel %vm1242_vm0, %v1237_v42, %v1323_v43 }
 0x132   : > { %v432_v48 = vperm.slane %v430_v44, 0  ;;  %v433_v51 = vperm.slane %v430_v44, 4  ;;  %v451_v50 = vperm.slane %v449_v45, 2  ;;  %v452_v49 = vperm.slane %v449_v45, 6 }
 0x133   : > { %v1326_v53 = vadd.f32 %v1644_v46, %v1324_v47 }
 0x134   : > { %v1227_v54 = vmul.f32 %v463_v7, %v432_v48  ;;  %v1228_v55 = vmul.f32 %v464_v4, %v433_v51  ;;  %v1229_v56 = vmul.f32 %v2221_v3, %v432_v48  ;;  %v1230_v57 = vmul.f32 %v2218_v1, %v433_v51 }
 0x135   : > { %v1231_v58 = vmul.f32 %v2221_v3, %v451_v50  ;;  %v1232_v59 = vmul.f32 %v2218_v1, %v452_v49  ;;  %v1233_v60 = vmul.f32 %v465_v11, %v451_v50  ;;  %v1234_v61 = vmul.f32 %v466_v12, %v452_v49  ;;  %1645 = vst.msk [vmem:[%s2175_s27 + $0x7] ss:$8 sm:$0x3] %vm2235_vm11, %v1326_v53  ;;  %v1638_v3 = vld [vmem:[%s2175_s27 + $0x4] ss:$8 sm:$0x3] }
 0x136   : > { %v1241_v63 = vrot.slane %v1228_v55, 7  ;;  %v1273_v0 = vrot.slane %v1230_v57, 7 }
 0x137   : > { %v1283_v37 = vrot.slane %v1232_v59, 7  ;;  %v1293_v1 = vrot.slane %v1234_v61, 7 }
 0x138   : > { %v1243_v4 = vsel %vm1242_vm0, %v1227_v54, %v1241_v63  ;;  %v1274_v5 = vsel %vm1242_vm0, %v1229_v56, %v1273_v0 }
 0x139   : > { %1249 = vst.msk [vmem:[%s298_s12] sm:$0x3] %vm2235_vm11, %v1243_v4  ;;  %v1276_v6 = vadd.f32 %v1634_v62, %v1274_v5  ;;  %v1284_v7 = vsel %vm1242_vm0, %v1231_v58, %v1283_v37  ;;  %v1294_v8 = vsel %vm1242_vm0, %v1233_v60, %v1293_v1 }
 0x13a   : > { %v1286_v10 = vadd.f32 %v1636_v2, %v1284_v7  ;;  %v1296_v11 = vadd.f32 %v1638_v3, %v1294_v8 }
 0x13b   : > { %1750 = shalt.err (!%p1747_p5)
}
 0x13c   : > { %1656 = dma.vmem_to_hbm [thread:$0]  (%p1906_p4), %s1350_s13, 32, %s1352_s15, %s1330_s14   ;;  %1635 = vst.msk [vmem:[%s2175_s27 + $0x2] ss:$8 sm:$0x3] %vm2235_vm11, %v1276_v6 }
 0x13d   : > { %1637 = vst.msk [vmem:[%s2175_s27 + $0x3] ss:$8 sm:$0x3] %vm2235_vm11, %v1286_v10  ;;  %s1335_s16 = scalar_lea.sflag [#allocation5], %s2164_s24  ;;  %s1765_s17 = sshra.s32 %s1367_s25, 4  ;;  %s1766_s17 = int_to_ptr.hbm [resolvable:$true] %s1765_s17 }
 0x13e   : > { %1639 = vst.msk [vmem:[%s2175_s27 + $0x4] ss:$8 sm:$0x3] %vm2235_vm11, %v1296_v11  ;;  %s1767_s29 = scalar_lea.hbm %s1766_s17, 16  ;;  %s1771_s14 = scalar_lea.hbm %s2344_s5, 32 }
 0x13f   : > { %p1768_p6 = scmp.ne.s32.totalorder %s1766_s17, %s1767_s29  ;;  %p1772_p10 = scmp.lt.s32.totalorder %s1766_s17, %s2344_s5 }
 0x140   : > { %p1773_p11 = scmp.lt.s32.totalorder %s1771_s14, %s1767_s29 }
 0x141   : > { %p1769_p7 = pnand %p1768_p6, %p1906_p4 }
 0x142   : > { %p1774_p12 = por %p1773_p11, %p1772_p10 }
 0x143   : > { %p1770_p9 = pneg %p1769_p7 }
 0x145   : > { %p1775_p13 = pnand %p1774_p12, %p1770_p9 }
 0x147   : > { %1778 = shalt.err (!%p1775_p13)
}
 0x148   : > { %1657 = dma.vmem_to_hbm [thread:$0]  (%p1906_p4), %s1365_s7, 256, %s1367_s25, %s1335_s16  }
 0x149 PF: > { %p1667_p0 = scmp.ge.s32.totalorder %s1833_s23, 2  ;;  %s1378_s24 = sand.u32 1, %s1813_s18  }
 0x14a   : > { %s1379_s27 = scalar_lea.sflag [#allocation3], %s1378_s24 }
 0x14b   : > { %p1661_p1 = pnand %p1667_p0, %p1913_p8 }
 0x14d   : > { %p1662_p2 = pneg %p1661_p1 }
 0x14f   : > { %1804 = dma.done.wait (%p1662_p2), %s1379_s27, 32  }
 0x150   : > { %1806 = vsyncadd (%p1662_p2), %s1379_s27, 4294967264  ;;  %s1389_s10 = scalar_lea.sflag [#allocation5], %s1378_s24 }
 0x151   : > { %1808 = dma.done.wait (%p1662_p2), %s1389_s10, 256  }
 0x152   : > { %1810 = vsyncadd (%p1662_p2), %s1389_s10, 4294967040  ;;  %s22_s23 = sadd.s32 1, %s1833_s23   ;;  %s2349_s18 = smov %s1817_s19 }
 0x153   : > { %p19_p3 = scmp.ge.s32.totalorder %s22_s23, 4   ;;  %s2350_s19 = smov %s1821_s20 }
 0x154   : > { %s2351_s20 = smov %s1919_s6  ;;  %s2352_s21 = smov %s1829_s22 }
 0x155   : > { %s2353_s22 = smov %s2355_s26  ;;  %21 = sbr.rel (!%p19_p3) target bundleno = 6 (0x6), region = 105 }
 0x15a   :  { %1395 = vsyncpa [#allocation3], 1 }
 0x15b   :  { %1397 = vsyncpa [#allocation3 + $0x1], 1 }
 0x15c   :  { %1398 = vsyncpa [#allocation5], 1 }
 0x15d   :  { %1400 = vsyncpa [#allocation5 + $0x1], 1 }

</bundles_post_ra>
